<compile_context>
chip_gen: v6e
topology: v6e:2x2x1
jax: 0.10.0
libtpu: 0.0.40
codegen_flags: <defaults>
</compile_context>

<pallas_src>
import numpy as np
import jax
import jax.numpy as jnp
from jax import lax
from jax.experimental import pallas as pl
from jax.experimental.pallas import tpu as pltpu  # noqa: F401  (TPU backend)

BN_EPS = 1e-5  # PyTorch BatchNorm2d default eps


def _aux_head_kernel(pool_ref, x_ref, w1_ref, g1_ref, b1_ref,
                     w2_ref, g2_ref, b2_ref, wfc_ref, bfc_ref, out_ref):
    # pool_ref: (P*N, N*H*W)  constant avg-pool matrix (rows: p-major, then n)
    # x_ref   : (N*H*W, Cin)  input, NHWC flattened to rows (channels on lanes)
    # w1_ref  : (Cin, 128)    1x1 conv weight (transposed)
    # g1/b1   : (1, 128)      BN1 affine
    # w2_ref  : (P, 128, 768) 2x2 conv weight, tap-major (p = kh*KW + kw)
    # g2/b2   : (1, 768)      BN2 affine
    # wfc_ref : (768, nc)     classifier weight (transposed)
    # bfc_ref : (1, nc)       classifier bias
    # out_ref : (N, nc)       logits
    n = out_ref.shape[0]
    n_tap = w2_ref.shape[0]
    c_out = w2_ref.shape[2]

    # --- ReLU + AvgPool2d(5, stride=2, pad=0) fused as one MXU matmul.
    x = jnp.maximum(x_ref[...], 0.0)                                 # (N*H*W, Cin)
    pooled = jnp.dot(pool_ref[...], x,
                     preferred_element_type=jnp.float32)             # (P*N, Cin)

    # --- Conv2d 1x1 (no bias) == channel matmul.
    h = jnp.dot(pooled, w1_ref[...],
                preferred_element_type=jnp.float32)                  # (P*N, 128)

    # --- BatchNorm2d(128): training-mode batch stats (biased var) + affine.
    m1 = jnp.mean(h, axis=0, keepdims=True)
    v1 = jnp.mean(jnp.square(h - m1), axis=0, keepdims=True)
    h = (h - m1) * lax.rsqrt(v1 + BN_EPS) * g1_ref[...] + b1_ref[...]
    h = jnp.maximum(h, 0.0)                                          # ReLU

    # --- Conv2d(128 -> 768, k=2, no bias) on the 2x2 map -> 1x1:
    #     sum over the 4 kernel taps of a (N,128)@(128,768) matmul.
    acc = jnp.dot(h[0:n, :], w2_ref[0], preferred_element_type=jnp.float32)
    for p in range(1, n_tap):
        acc = acc + jnp.dot(h[p * n:(p + 1) * n, :], w2_ref[p],
                            preferred_element_type=jnp.float32)      # (N, 768)

    # --- BatchNorm2d(768) + ReLU.
    m2 = jnp.mean(acc, axis=0, keepdims=True)
    v2 = jnp.mean(jnp.square(acc - m2), axis=0, keepdims=True)
    z = (acc - m2) * lax.rsqrt(v2 + BN_EPS) * g2_ref[...] + b2_ref[...]
    z = jnp.maximum(z, 0.0)                                          # (N, 768)
    del c_out

    # TODO(synk): Dropout(0.5) is identity here (inference mode); training-mode
    # dropout would need pltpu.prng_seed / prng_random_bits.
    out_ref[...] = (jnp.dot(z, wfc_ref[...], preferred_element_type=jnp.float32)
                    + bfc_ref[...]).astype(out_ref.dtype)


def _build_pool_matrix(n, h, w, k=5, stride=2):
    """Constant matrix so that (P*N, N*H*W) @ (N*H*W, C) == ReLU'd avg-pool.

    padding=0 -> every window is fully inside the image, so
    count_include_pad=False is irrelevant and the divisor is always k*k.
    Output rows are ordered tap-major: row = p * n + batch, p = oh*OW + ow.
    """
    oh_n = (h - k) // stride + 1
    ow_n = (w - k) // stride + 1
    mat = np.zeros((oh_n * ow_n * n, n * h * w), np.float32)
    inv = 1.0 / float(k * k)
    for oh in range(oh_n):
        for ow in range(ow_n):
            p = oh * ow_n + ow
            for b in range(n):
                row = p * n + b
                for kh in range(k):
                    for kw in range(k):
                        ih, iw = oh * stride + kh, ow * stride + kw
                        mat[row, b * h * w + ih * w + iw] = inv
    return mat


def aux_head_forward(params, x_nchw):
    """Pallas forward of AuxiliaryHeadCifar. x_nchw: (N, C_in, H, W)."""
    w1, g1, b1, w2, g2, b2, wfc, bfc = params
    n, c_in, h, w = x_nchw.shape
    c_mid = w1.shape[0]            # 128
    c_out, _, kh, kw = w2.shape    # 768, 128, 2, 2
    nc = wfc.shape[0]

    oh_n = (h - 5) // 2 + 1
    ow_n = (w - 5) // 2 + 1
    assert (oh_n, ow_n) == (kh, kw), "pooled map must match conv2 kernel (1x1 out)"
    n_tap = kh * kw

    # Layout transforms (fuse under jit; channels end up on the lane axis).
    x_rows = jnp.transpose(x_nchw, (0, 2, 3, 1)).reshape(n * h * w, c_in)
    pool_mat = jnp.asarray(_build_pool_matrix(n, h, w))                 # (P*N, N*H*W)
    w1k = jnp.transpose(w1.reshape(c_mid, c_in), (1, 0))                # (Cin, 128)
    w2k = jnp.transpose(w2, (2, 3, 1, 0)).reshape(n_tap, c_mid, c_out)  # (P,128,768)
    wfck = jnp.transpose(wfc, (1, 0))                                   # (768, nc)

    m_in = n * h * w
    m_pool = n_tap * n

    return pl.pallas_call(
        _aux_head_kernel,
        out_shape=jax.ShapeDtypeStruct((n, nc), jnp.float32),
        in_specs=[
            pl.BlockSpec((m_pool, m_in), lambda: (0, 0)),
            pl.BlockSpec((m_in, c_in), lambda: (0, 0)),
            pl.BlockSpec((c_in, c_mid), lambda: (0, 0)),
            pl.BlockSpec((1, c_mid), lambda: (0, 0)),
            pl.BlockSpec((1, c_mid), lambda: (0, 0)),
            pl.BlockSpec((n_tap, c_mid, c_out), lambda: (0, 0, 0)),
            pl.BlockSpec((1, c_out), lambda: (0, 0)),
            pl.BlockSpec((1, c_out), lambda: (0, 0)),
            pl.BlockSpec((c_out, nc), lambda: (0, 0)),
            pl.BlockSpec((1, nc), lambda: (0, 0)),
        ],
        out_specs=pl.BlockSpec((n, nc), lambda: (0, 0)),
    )(pool_mat, x_rows, w1k, g1.reshape(1, c_mid), b1.reshape(1, c_mid),
      w2k, g2.reshape(1, c_out), b2.reshape(1, c_out),
      wfck, bfc.reshape(1, nc))


# ----------------------------- pure-JAX reference -----------------------------

def _bn_nchw_train(x, gamma, beta, eps=BN_EPS):
    mean = jnp.mean(x, axis=(0, 2, 3), keepdims=True)
    var = jnp.mean(jnp.square(x - mean), axis=(0, 2, 3), keepdims=True)
    return ((x - mean) * lax.rsqrt(var + eps)
            * gamma.reshape(1, -1, 1, 1) + beta.reshape(1, -1, 1, 1))


def _reference_forward(params, x):
    w1, g1, b1, w2, g2, b2, wfc, bfc = params
    n = x.shape[0]
    x = jnp.maximum(x, 0.0)
    x = lax.reduce_window(x, 0.0, lax.add,
                          (1, 1, 5, 5), (1, 1, 2, 2), "VALID") / 25.0
    x = jnp.einsum("nchw,oc->nohw", x, w1[:, :, 0, 0])
    x = jnp.maximum(_bn_nchw_train(x, g1, b1), 0.0)
    x = lax.conv_general_dilated(x, w2, window_strides=(1, 1), padding="VALID",
                                 dimension_numbers=("NCHW", "OIHW", "NCHW"))
    x = jnp.maximum(_bn_nchw_train(x, g2, b2), 0.0)
    x = x.reshape(n, -1)
    return x @ wfc.T + bfc[None, :]


if __name__ == "__main__":
    key = jax.random.PRNGKey(0)
    N, C_IN, H, NUM_CLASSES = 2, 64, 8, 10

    ks = jax.random.split(key, 9)
    x = jax.random.normal(ks[0], (N, C_IN, H, H), jnp.float32)
    w1 = jax.random.normal(ks[1], (128, C_IN, 1, 1), jnp.float32) / np.sqrt(C_IN)
    g1 = 1.0 + 0.1 * jax.random.normal(ks[2], (128,), jnp.float32)
    b1 = 0.1 * jax.random.normal(ks[3], (128,), jnp.float32)
    w2 = jax.random.normal(ks[4], (768, 128, 2, 2), jnp.float32) / np.sqrt(128 * 4)
    g2 = 1.0 + 0.1 * jax.random.normal(ks[5], (768,), jnp.float32)
    b2 = 0.1 * jax.random.normal(ks[6], (768,), jnp.float32)
    wfc = jax.random.normal(ks[7], (NUM_CLASSES, 768), jnp.float32) / np.sqrt(768)
    bfc = 0.1 * jax.random.normal(ks[8], (NUM_CLASSES,), jnp.float32)
    params = (w1, g1, b1, w2, g2, b2, wfc, bfc)

    out = jax.jit(aux_head_forward)(params, x)
    out = jax.block_until_ready(out)

    ref = jax.block_until_ready(_reference_forward(params, x))

    np.testing.assert_allclose(np.asarray(out), np.asarray(ref),
                               rtol=2e-3, atol=2e-3)
    print("KERNEL_OK")
</pallas_src>

<mosaic_0001>
module attributes {stable_mosaic.version = 11 : i64} {
  func.func @_aux_head_kernel(%arg0: memref<8x128xf32, #tpu.memory_space<vmem>>, %arg1: memref<128x64xf32, #tpu.memory_space<vmem>>, %arg2: memref<64x128xf32, #tpu.memory_space<vmem>>, %arg3: memref<1x128xf32, #tpu.memory_space<vmem>>, %arg4: memref<1x128xf32, #tpu.memory_space<vmem>>, %arg5: memref<4x128x768xf32, #tpu.memory_space<vmem>>, %arg6: memref<1x768xf32, #tpu.memory_space<vmem>>, %arg7: memref<1x768xf32, #tpu.memory_space<vmem>>, %arg8: memref<768x10xf32, #tpu.memory_space<vmem>>, %arg9: memref<1x10xf32, #tpu.memory_space<vmem>>, %arg10: memref<2x10xf32, #tpu.memory_space<vmem>>) attributes {dimension_semantics = [], scalar_prefetch = 0 : i64, scratch_operands = 0 : i64, tpu.core_type = #tpu.core_type<tc>} {
    %c0 = arith.constant 0 : index
    %c0_0 = arith.constant 0 : index
    %0 = vector.load %arg1[%c0, %c0_0] : memref<128x64xf32, #tpu.memory_space<vmem>>, vector<128x64xf32>
    %cst = arith.constant 0.000000e+00 : f32
    %1 = vector.broadcast %cst : f32 to vector<128x64xf32>
    %2 = arith.maximumf %0, %1 : vector<128x64xf32>
    %c0_1 = arith.constant 0 : index
    %c0_2 = arith.constant 0 : index
    %3 = vector.load %arg0[%c0_1, %c0_2] : memref<8x128xf32, #tpu.memory_space<vmem>>, vector<8x128xf32>
    %cst_3 = arith.constant dense<0.000000e+00> : vector<8x64xf32>
    %4 = tpu.matmul %3, %2, %cst_3 {dimension_numbers = #tpu.dot_dimension_numbers<[1], [0], [0], [1], [0, 0, 1, 1], [], []>} : vector<8x128xf32>, vector<128x64xf32>, vector<8x64xf32> -> vector<8x64xf32>
    %c0_4 = arith.constant 0 : index
    %c0_5 = arith.constant 0 : index
    %5 = vector.load %arg2[%c0_4, %c0_5] : memref<64x128xf32, #tpu.memory_space<vmem>>, vector<64x128xf32>
    %cst_6 = arith.constant dense<0.000000e+00> : vector<8x128xf32>
    %6 = tpu.matmul %4, %5, %cst_6 {dimension_numbers = #tpu.dot_dimension_numbers<[1], [0], [0], [1], [0, 0, 1, 1], [], []>} : vector<8x64xf32>, vector<64x128xf32>, vector<8x128xf32> -> vector<8x128xf32>
    %cst_7 = arith.constant dense<0.000000e+00> : vector<128xf32>
    %7 = vector.multi_reduction <add>, %6, %cst_7 [0] : vector<8x128xf32> to vector<128xf32>
    %8 = vector.shape_cast %7 : vector<128xf32> to vector<1x128xf32>
    %cst_8 = arith.constant 8.000000e+00 : f32
    %9 = vector.broadcast %cst_8 : f32 to vector<1x128xf32>
    %10 = arith.divf %8, %9 : vector<1x128xf32>
    %11 = vector.broadcast %10 : vector<1x128xf32> to vector<8x128xf32>
    %12 = arith.subf %6, %11 : vector<8x128xf32>
    %13 = arith.mulf %12, %12 : vector<8x128xf32>
    %cst_9 = arith.constant dense<0.000000e+00> : vector<128xf32>
    %14 = vector.multi_reduction <add>, %13, %cst_9 [0] : vector<8x128xf32> to vector<128xf32>
    %15 = vector.shape_cast %14 : vector<128xf32> to vector<1x128xf32>
    %cst_10 = arith.constant 8.000000e+00 : f32
    %16 = vector.broadcast %cst_10 : f32 to vector<1x128xf32>
    %17 = arith.divf %15, %16 : vector<1x128xf32>
    %18 = vector.broadcast %10 : vector<1x128xf32> to vector<8x128xf32>
    %19 = arith.subf %6, %18 : vector<8x128xf32>
    %cst_11 = arith.constant 9.99999974E-6 : f32
    %20 = vector.broadcast %cst_11 : f32 to vector<1x128xf32>
    %21 = arith.addf %17, %20 : vector<1x128xf32>
    %22 = math.rsqrt %21 : vector<1x128xf32>
    %23 = vector.broadcast %22 : vector<1x128xf32> to vector<8x128xf32>
    %24 = arith.mulf %19, %23 : vector<8x128xf32>
    %c0_12 = arith.constant 0 : index
    %c0_13 = arith.constant 0 : index
    %25 = vector.load %arg3[%c0_12, %c0_13] : memref<1x128xf32, #tpu.memory_space<vmem>>, vector<1x128xf32>
    %26 = vector.broadcast %25 : vector<1x128xf32> to vector<8x128xf32>
    %27 = arith.mulf %24, %26 : vector<8x128xf32>
    %c0_14 = arith.constant 0 : index
    %c0_15 = arith.constant 0 : index
    %28 = vector.load %arg4[%c0_14, %c0_15] : memref<1x128xf32, #tpu.memory_space<vmem>>, vector<1x128xf32>
    %29 = vector.broadcast %28 : vector<1x128xf32> to vector<8x128xf32>
    %30 = arith.addf %27, %29 : vector<8x128xf32>
    %cst_16 = arith.constant 0.000000e+00 : f32
    %31 = vector.broadcast %cst_16 : f32 to vector<8x128xf32>
    %32 = arith.maximumf %30, %31 : vector<8x128xf32>
    %33 = vector.extract_strided_slice %32 {offsets = [0, 0], sizes = [2, 128], strides = [1, 1]} : vector<8x128xf32> to vector<2x128xf32>
    %c0_17 = arith.constant 0 : index
    %c0_18 = arith.constant 0 : index
    %c0_19 = arith.constant 0 : index
    %34 = vector.load %arg5[%c0_17, %c0_18, %c0_19] : memref<4x128x768xf32, #tpu.memory_space<vmem>>, vector<1x128x768xf32>
    %35 = vector.shape_cast %34 : vector<1x128x768xf32> to vector<128x768xf32>
    %cst_20 = arith.constant dense<0.000000e+00> : vector<2x768xf32>
    %36 = tpu.matmul %33, %35, %cst_20 {dimension_numbers = #tpu.dot_dimension_numbers<[1], [0], [0], [1], [0, 0, 1, 1], [], []>} : vector<2x128xf32>, vector<128x768xf32>, vector<2x768xf32> -> vector<2x768xf32>
    %37 = vector.extract_strided_slice %32 {offsets = [2, 0], sizes = [2, 128], strides = [1, 1]} : vector<8x128xf32> to vector<2x128xf32>
    %c1 = arith.constant 1 : index
    %c0_21 = arith.constant 0 : index
    %c0_22 = arith.constant 0 : index
    %38 = vector.load %arg5[%c1, %c0_21, %c0_22] : memref<4x128x768xf32, #tpu.memory_space<vmem>>, vector<1x128x768xf32>
    %39 = vector.shape_cast %38 : vector<1x128x768xf32> to vector<128x768xf32>
    %cst_23 = arith.constant dense<0.000000e+00> : vector<2x768xf32>
    %40 = tpu.matmul %37, %39, %cst_23 {dimension_numbers = #tpu.dot_dimension_numbers<[1], [0], [0], [1], [0, 0, 1, 1], [], []>} : vector<2x128xf32>, vector<128x768xf32>, vector<2x768xf32> -> vector<2x768xf32>
    %41 = arith.addf %36, %40 : vector<2x768xf32>
    %42 = vector.extract_strided_slice %32 {offsets = [4, 0], sizes = [2, 128], strides = [1, 1]} : vector<8x128xf32> to vector<2x128xf32>
    %c2 = arith.constant 2 : index
    %c0_24 = arith.constant 0 : index
    %c0_25 = arith.constant 0 : index
    %43 = vector.load %arg5[%c2, %c0_24, %c0_25] : memref<4x128x768xf32, #tpu.memory_space<vmem>>, vector<1x128x768xf32>
    %44 = vector.shape_cast %43 : vector<1x128x768xf32> to vector<128x768xf32>
    %cst_26 = arith.constant dense<0.000000e+00> : vector<2x768xf32>
    %45 = tpu.matmul %42, %44, %cst_26 {dimension_numbers = #tpu.dot_dimension_numbers<[1], [0], [0], [1], [0, 0, 1, 1], [], []>} : vector<2x128xf32>, vector<128x768xf32>, vector<2x768xf32> -> vector<2x768xf32>
    %46 = arith.addf %41, %45 : vector<2x768xf32>
    %47 = vector.extract_strided_slice %32 {offsets = [6, 0], sizes = [2, 128], strides = [1, 1]} : vector<8x128xf32> to vector<2x128xf32>
    %c3 = arith.constant 3 : index
    %c0_27 = arith.constant 0 : index
    %c0_28 = arith.constant 0 : index
    %48 = vector.load %arg5[%c3, %c0_27, %c0_28] : memref<4x128x768xf32, #tpu.memory_space<vmem>>, vector<1x128x768xf32>
    %49 = vector.shape_cast %48 : vector<1x128x768xf32> to vector<128x768xf32>
    %cst_29 = arith.constant dense<0.000000e+00> : vector<2x768xf32>
    %50 = tpu.matmul %47, %49, %cst_29 {dimension_numbers = #tpu.dot_dimension_numbers<[1], [0], [0], [1], [0, 0, 1, 1], [], []>} : vector<2x128xf32>, vector<128x768xf32>, vector<2x768xf32> -> vector<2x768xf32>
    %51 = arith.addf %46, %50 : vector<2x768xf32>
    %cst_30 = arith.constant dense<0.000000e+00> : vector<768xf32>
    %52 = vector.multi_reduction <add>, %51, %cst_30 [0] : vector<2x768xf32> to vector<768xf32>
    %53 = vector.shape_cast %52 : vector<768xf32> to vector<1x768xf32>
    %cst_31 = arith.constant 2.000000e+00 : f32
    %54 = vector.broadcast %cst_31 : f32 to vector<1x768xf32>
    %55 = arith.divf %53, %54 : vector<1x768xf32>
    %56 = vector.broadcast %55 : vector<1x768xf32> to vector<2x768xf32>
    %57 = arith.subf %51, %56 : vector<2x768xf32>
    %58 = arith.mulf %57, %57 : vector<2x768xf32>
    %cst_32 = arith.constant dense<0.000000e+00> : vector<768xf32>
    %59 = vector.multi_reduction <add>, %58, %cst_32 [0] : vector<2x768xf32> to vector<768xf32>
    %60 = vector.shape_cast %59 : vector<768xf32> to vector<1x768xf32>
    %cst_33 = arith.constant 2.000000e+00 : f32
    %61 = vector.broadcast %cst_33 : f32 to vector<1x768xf32>
    %62 = arith.divf %60, %61 : vector<1x768xf32>
    %63 = vector.broadcast %55 : vector<1x768xf32> to vector<2x768xf32>
    %64 = arith.subf %51, %63 : vector<2x768xf32>
    %cst_34 = arith.constant 9.99999974E-6 : f32
    %65 = vector.broadcast %cst_34 : f32 to vector<1x768xf32>
    %66 = arith.addf %62, %65 : vector<1x768xf32>
    %67 = math.rsqrt %66 : vector<1x768xf32>
    %68 = vector.broadcast %67 : vector<1x768xf32> to vector<2x768xf32>
    %69 = arith.mulf %64, %68 : vector<2x768xf32>
    %c0_35 = arith.constant 0 : index
    %c0_36 = arith.constant 0 : index
    %70 = vector.load %arg6[%c0_35, %c0_36] : memref<1x768xf32, #tpu.memory_space<vmem>>, vector<1x768xf32>
    %71 = vector.broadcast %70 : vector<1x768xf32> to vector<2x768xf32>
    %72 = arith.mulf %69, %71 : vector<2x768xf32>
    %c0_37 = arith.constant 0 : index
    %c0_38 = arith.constant 0 : index
    %73 = vector.load %arg7[%c0_37, %c0_38] : memref<1x768xf32, #tpu.memory_space<vmem>>, vector<1x768xf32>
    %74 = vector.broadcast %73 : vector<1x768xf32> to vector<2x768xf32>
    %75 = arith.addf %72, %74 : vector<2x768xf32>
    %cst_39 = arith.constant 0.000000e+00 : f32
    %76 = vector.broadcast %cst_39 : f32 to vector<2x768xf32>
    %77 = arith.maximumf %75, %76 : vector<2x768xf32>
    %c0_40 = arith.constant 0 : index
    %c0_41 = arith.constant 0 : index
    %78 = vector.load %arg8[%c0_40, %c0_41] : memref<768x10xf32, #tpu.memory_space<vmem>>, vector<768x10xf32>
    %cst_42 = arith.constant dense<0.000000e+00> : vector<2x10xf32>
    %79 = tpu.matmul %77, %78, %cst_42 {dimension_numbers = #tpu.dot_dimension_numbers<[1], [0], [0], [1], [0, 0, 1, 1], [], []>} : vector<2x768xf32>, vector<768x10xf32>, vector<2x10xf32> -> vector<2x10xf32>
    %c0_43 = arith.constant 0 : index
    %c0_44 = arith.constant 0 : index
    %80 = vector.load %arg9[%c0_43, %c0_44] : memref<1x10xf32, #tpu.memory_space<vmem>>, vector<1x10xf32>
    %81 = vector.broadcast %80 : vector<1x10xf32> to vector<2x10xf32>
    %82 = arith.addf %79, %81 : vector<2x10xf32>
    %c0_45 = arith.constant 0 : index
    %c0_46 = arith.constant 0 : index
    %83 = vector.load %arg10[%c0_45, %c0_46] : memref<2x10xf32, #tpu.memory_space<vmem>>, vector<2x10xf32>
    tpu.vector_store %arg10[%c0_45, %c0_46], %82 {strides = array<i32>} : memref<2x10xf32, #tpu.memory_space<vmem>>, vector<2x10xf32>,
    return
  }
}

</mosaic_0001>

<bundles_post_ra>
// kernel: aux_head_forward.1
= control target key start
LH: loop header
LB: loop body
LE: loop exit
PB: predicated region body
PF: predicated region fallthrough
CT: control target
= control target key end

     0   :  { %v2571_v3 = vmov 0.0   ;;  %vm2572_vm0 = vmmov 0   ;;  %s4289_s0 = inlined_call_operand.vmem [shape: f32[8,128], index: 0, kind: input, shape index: {}]   ;;  %s4290_s1 = inlined_call_operand.vmem [shape: f32[128,64], index: 1, kind: input, shape index: {}]   ;;  %s4291_s2 = inlined_call_operand.vmem [shape: f32[64,128], index: 2, kind: input, shape index: {}]   ;;  %s4292_s3 = inlined_call_operand.vmem [shape: f32[1,128], index: 3, kind: input, shape index: {}]   ;;  %s4293_s4 = inlined_call_operand.vmem [shape: f32[1,128], index: 4, kind: input, shape index: {}]   ;;  %s4294_s5 = inlined_call_operand.vmem [shape: f32[4,128,768], index: 5, kind: input, shape index: {}]   ;;  %s4295_s6 = inlined_call_operand.vmem [shape: f32[1,768], index: 6, kind: input, shape index: {}]   ;;  %s4296_s7 = inlined_call_operand.vmem [shape: f32[1,768], index: 7, kind: input, shape index: {}]   ;;  %s4297_s8 = inlined_call_operand.vmem [shape: f32[768,10], index: 8, kind: input, shape index: {}]   ;;  %s4298_s9 = inlined_call_operand.vmem [shape: f32[1,10], index: 9, kind: input, shape index: {}]   ;;  %s4299_s10 = inlined_call_operand.hbm [shape: f32[2,10], index: 10, kind: output, shape index: {}]  }
   0x1   :  { %v51_v0 = vld [vmem:[%s4290_s1 + $0x78] sm:$0xff]  ;;  %v50_v1 = vld [vmem:[%s4290_s1 + $0x70] sm:$0xff]  ;;  %v49_v2 = vld [vmem:[%s4290_s1 + $0x68] sm:$0xff]  ;;  %2478 = vmatprep.subr.mxu0 %v2571_v3  ;;  %2510 = vmatprep.mubr.msk.f32.mxu0 %vm2572_vm0, %v2571_v3 }
   0x2   :  { %v67_v4 = vmax.f32 %v51_v0, 0.0  ;;  %v66_v5 = vmax.f32 %v50_v1, 0.0  ;;  %v48_v6 = vld [vmem:[%s4290_s1 + $0x60] sm:$0xff]  ;;  %2513 = vmatprep.subr.mxu1 %v2571_v3  ;;  %2529 = vmatprep.mubr.msk.f32.mxu1 %vm2572_vm0, %v2571_v3  ;;  %v65_v7 = vmax.f32 %v49_v2, 0.0  ;;  %v47_v8 = vld [vmem:[%s4290_s1 + $0x58] sm:$0xff]  ;;  %v46_v11 = vld [vmem:[%s4290_s1 + $0x50] sm:$0xff] }
   0x3   :  { %v64_v9 = vmax.f32 %v48_v6, 0.0  ;;  %v146_v10 = vld [vmem:[%s4291_s2 + $0x38] sm:$0xff]  ;;  %v145_v12 = vld [vmem:[%s4291_s2 + $0x30] sm:$0xff]  ;;  %v63_v13 = vmax.f32 %v47_v8, 0.0  ;;  %v144_v14 = vld [vmem:[%s4291_s2 + $0x28] sm:$0xff] }
   0x4   :  { %2479 = vmatpush3.msra.mxu0 %v67_v4  ;;  %2514 = vmatpush3.msra.mxu1 %v146_v10  ;;  %v45_v15 = vld [vmem:[%s4290_s1 + $0x48] sm:$0xff] }
   0x5   :  { %2480 = vmatprep.subr.mxu0 %v2571_v3  ;;  %2515 = vmatprep.subr.mxu1 %v2571_v3 }
   0x6   :  { %2481 = vmatpush3.msra.mxu0 %v66_v5  ;;  %2516 = vmatpush3.msra.mxu1 %v145_v12 }
   0x7   :  { %2482 = vmatprep.subr.mxu0 %v2571_v3 }
   0x8   :  { %2483 = vmatpush3.msra.mxu0 %v65_v7 }
   0x9   :  { %2484 = vmatprep.subr.mxu0 %v2571_v3 }
   0xa   :  { %15 = vsyncpa [#allocation3], 0  ;;  %2485 = vmatpush3.msra.mxu0 %v64_v9  ;;  %v62_v16 = vmax.f32 %v46_v11, 0.0  ;;  %2517 = vmatprep.subr.mxu1 %v2571_v3  ;;  %v143_v17 = vld [vmem:[%s4291_s2 + $0x20] sm:$0xff]  ;;  %v61_v19 = vmax.f32 %v45_v15, 0.0  ;;  %v142_v20 = vld [vmem:[%s4291_s2 + $0x18] sm:$0xff] }
   0xb   :  { %2486 = vmatprep.subr.mxu0 %v2571_v3  ;;  %v44_v18 = vld [vmem:[%s4290_s1 + $0x40] sm:$0xff]  ;;  %2518 = vmatpush3.msra.mxu1 %v144_v14  ;;  %v43_v21 = vld [vmem:[%s4290_s1 + $0x38] sm:$0xff]  ;;  %v141_v23 = vld [vmem:[%s4291_s2 + $0x10] sm:$0xff]  ;;  %vm147_vm1 = vcmask 523264   ;;  %vm1516_vm2 = vcmask 1041408   ;;  %s2573_s15 = smov [#allocation2]  }
   0xc   :  { %2487 = vmatpush3.msra.mxu0 %v63_v13  ;;  %2519 = vmatprep.subr.mxu1 %v2571_v3  ;;  %v60_v22 = vmax.f32 %v44_v18, 0.0  ;;  %v42_v24 = vld [vmem:[%s4290_s1 + $0x30] sm:$0xff]  ;;  %v59_v25 = vmax.f32 %v43_v21, 0.0  ;;  %v140_v26 = vld [vmem:[%s4291_s2 + $0x8] sm:$0xff]  ;;  %v40_v29 = vld [vmem:[%s4290_s1 + $0x20] sm:$0xff]  ;;  %s2047_s16 = sshll.u32 %s2573_s15, 4  ;;  %s2048_s16 = int_to_ptr.vmem [resolvable:$true] %s2047_s16 }
   0xd   :  { %2488 = vmatprep.subr.mxu0 %v2571_v3  ;;  %2520 = vmatpush3.msra.mxu1 %v143_v17  ;;  %v41_v27 = vld [vmem:[%s4290_s1 + $0x28] sm:$0xff]  ;;  %v58_v28 = vmax.f32 %v42_v24, 0.0  ;;  %v39_v31 = vld [vmem:[%s4290_s1 + $0x18] sm:$0xff]  ;;  %v56_v32 = vmax.f32 %v40_v29, 0.0  ;;  %v38_v33 = vld [vmem:[%s4290_s1 + $0x10] sm:$0xff]  ;;  %vm2039_vm3 = vcmask 74752   ;;  %p2554_p1 = scmp.lt.s32.totalorder %s2048_s16, %s2048_s16 }
   0xe   :  { %2489 = vmatpush3.msra.mxu0 %v62_v16  ;;  %2521 = vmatprep.subr.mxu1 %v2571_v3  ;;  %v57_v30 = vmax.f32 %v41_v27, 0.0  ;;  %v55_v34 = vmax.f32 %v39_v31, 0.0  ;;  %v37_v35 = vld [vmem:[%s4290_s1 + $0x8] sm:$0xff]  ;;  %v54_v36 = vmax.f32 %v38_v33, 0.0  ;;  %v36_v37 = vld [vmem:[%s4290_s1] sm:$0xff]  ;;  %v2149_v44 = vld [vmem:[%s4294_s5 + $0x5d8] sm:$0xff] }
   0xf   :  { %2490 = vmatprep.subr.mxu0 %v2571_v3  ;;  %2522 = vmatpush3.msra.mxu1 %v142_v20  ;;  %v53_v38 = vmax.f32 %v37_v35, 0.0  ;;  %v52_v39 = vmax.f32 %v36_v37, 0.0  ;;  %v68_v40 = vld [vmem:[%s4289_s0] sm:$0xff]  ;;  %v2151_v45 = vld [vmem:[%s4294_s5 + $0x5e8] sm:$0xff]  ;;  %v2148_v46 = vld [vmem:[%s4294_s5 + $0x5d0] sm:$0xff]  ;;  %s2549_s17 = scalar_lea.vmem %s2048_s16, 32 }
  0x10   :  { %2491 = vmatpush3.msra.mxu0 %v61_v19  ;;  %2523 = vmatprep.subr.mxu1 %v2571_v3  ;;  %v139_v41 = vld [vmem:[%s4291_s2] sm:$0xff]  ;;  %v2143_v48 = vld [vmem:[%s4294_s5 + $0x5a8] sm:$0xff]  ;;  %v2145_v49 = vld [vmem:[%s4294_s5 + $0x5b8] sm:$0xff]  ;;  %p2550_p0 = scmp.ne.s32.totalorder %s2048_s16, %s2549_s17  ;;  %p2555_p2 = scmp.lt.s32.totalorder %s2549_s17, %s2549_s17 }
  0x11   :  { %2492 = vmatprep.subr.mxu0 %v2571_v3  ;;  %2524 = vmatpush3.msra.mxu1 %v141_v23  ;;  %v2150_v47 = vld [vmem:[%s4294_s5 + $0x5e0] sm:$0xff]  ;;  %v2144_v51 = vld [vmem:[%s4294_s5 + $0x5b0] sm:$0xff]  ;;  %v2137_v52 = vld [vmem:[%s4294_s5 + $0x578] sm:$0xff] }
  0x12   :  { %2493 = vmatpush3.msra.mxu0 %v60_v22  ;;  %2525 = vmatprep.subr.mxu1 %v2571_v3  ;;  %v2142_v50 = vld [vmem:[%s4294_s5 + $0x5a0] sm:$0xff]  ;;  %v2139_v53 = vld [vmem:[%s4294_s5 + $0x588] sm:$0xff]  ;;  %v2136_v54 = vld [vmem:[%s4294_s5 + $0x570] sm:$0xff]  ;;  %p2556_p3 = por %p2555_p2, %p2554_p1 }
  0x13   :  { %2494 = vmatprep.subr.mxu0 %v2571_v3  ;;  %2526 = vmatpush3.msra.mxu1 %v140_v26  ;;  %v2138_v55 = vld [vmem:[%s4294_s5 + $0x580] sm:$0xff]  ;;  %v2131_v56 = vld [vmem:[%s4294_s5 + $0x548] sm:$0xff]  ;;  %v2133_v57 = vld [vmem:[%s4294_s5 + $0x558] sm:$0xff] }
  0x14   :  { %2495 = vmatpush3.msra.mxu0 %v59_v25  ;;  %2527 = vmatprep.subr.mxu1 %v2571_v3  ;;  %v2130_v58 = vld [vmem:[%s4294_s5 + $0x540] sm:$0xff]  ;;  %v2132_v59 = vld [vmem:[%s4294_s5 + $0x550] sm:$0xff]  ;;  %v2125_v60 = vld [vmem:[%s4294_s5 + $0x518] sm:$0xff]  ;;  %p2557_p4 = pnand %p2556_p3, %p2550_p0 }
  0x15   :  { %2496 = vmatprep.subr.mxu0 %v2571_v3  ;;  %2528 = vmatpush3.msra.mxu1 %v139_v41  ;;  %v2127_v61 = vld [vmem:[%s4294_s5 + $0x528] sm:$0xff]  ;;  %v2124_v62 = vld [vmem:[%s4294_s5 + $0x510] sm:$0xff]  ;;  %v2126_v63 = vld [vmem:[%s4294_s5 + $0x520] sm:$0xff] }
  0x16   :  { %2497 = vmatpush3.msra.mxu0 %v58_v28  ;;  %454 = vmatprep.subr.mxu1 %v2149_v44  ;;  %v2119_v0 = vld [vmem:[%s4294_s5 + $0x4e8] sm:$0xff]  ;;  %v2121_v1 = vld [vmem:[%s4294_s5 + $0x4f8] sm:$0xff]  ;;  %v2118_v2 = vld [vmem:[%s4294_s5 + $0x4e0] sm:$0xff] }
  0x17   :  { %2498 = vmatprep.subr.mxu0 %v2571_v3  ;;  %v2120_v4 = vld [vmem:[%s4294_s5 + $0x4f0] sm:$0xff]  ;;  %v2113_v5 = vld [vmem:[%s4294_s5 + $0x4b8] sm:$0xff]  ;;  %v2115_v6 = vld [vmem:[%s4294_s5 + $0x4c8] sm:$0xff] }
  0x18   :  { %2499 = vmatpush3.msra.mxu0 %v57_v30  ;;  %v2112_v7 = vld [vmem:[%s4294_s5 + $0x4b0] sm:$0xff]  ;;  %v2114_v8 = vld [vmem:[%s4294_s5 + $0x4c0] sm:$0xff]  ;;  %v2107_v9 = vld [vmem:[%s4294_s5 + $0x488] sm:$0xff] }
  0x19   :  { %2500 = vmatprep.subr.mxu0 %v2571_v3  ;;  %v2109_v10 = vld [vmem:[%s4294_s5 + $0x498] sm:$0xff]  ;;  %v2106_v11 = vld [vmem:[%s4294_s5 + $0x480] sm:$0xff]  ;;  %v2108_v12 = vld [vmem:[%s4294_s5 + $0x490] sm:$0xff] }
  0x1a   :  { %2501 = vmatpush3.msra.mxu0 %v56_v32  ;;  %v2101_v13 = vld [vmem:[%s4294_s5 + $0x458] sm:$0xff]  ;;  %v2103_v14 = vld [vmem:[%s4294_s5 + $0x468] sm:$0xff]  ;;  %v2100_v15 = vld [vmem:[%s4294_s5 + $0x450] sm:$0xff] }
  0x1b   :  { %2502 = vmatprep.subr.mxu0 %v2571_v3  ;;  %v2102_v16 = vld [vmem:[%s4294_s5 + $0x460] sm:$0xff]  ;;  %v2095_v17 = vld [vmem:[%s4294_s5 + $0x428] sm:$0xff]  ;;  %v2097_v18 = vld [vmem:[%s4294_s5 + $0x438] sm:$0xff] }
  0x1c   :  { %2503 = vmatpush3.msra.mxu0 %v55_v34  ;;  %v2094_v19 = vld [vmem:[%s4294_s5 + $0x420] sm:$0xff]  ;;  %v2096_v20 = vld [vmem:[%s4294_s5 + $0x430] sm:$0xff]  ;;  %v2089_v21 = vld [vmem:[%s4294_s5 + $0x3f8] sm:$0xff] }
  0x1d   :  { %2504 = vmatprep.subr.mxu0 %v2571_v3  ;;  %v2091_v22 = vld [vmem:[%s4294_s5 + $0x408] sm:$0xff]  ;;  %v2088_v23 = vld [vmem:[%s4294_s5 + $0x3f0] sm:$0xff]  ;;  %v2090_v24 = vld [vmem:[%s4294_s5 + $0x400] sm:$0xff] }
  0x1e   :  { %2505 = vmatpush3.msra.mxu0 %v54_v36  ;;  %v2083_v25 = vld [vmem:[%s4294_s5 + $0x3c8] sm:$0xff]  ;;  %v2085_v26 = vld [vmem:[%s4294_s5 + $0x3d8] sm:$0xff]  ;;  %v2082_v27 = vld [vmem:[%s4294_s5 + $0x3c0] sm:$0xff] }
  0x1f   :  { %2506 = vmatprep.subr.mxu0 %v2571_v3  ;;  %v2084_v28 = vld [vmem:[%s4294_s5 + $0x3d0] sm:$0xff]  ;;  %v2077_v29 = vld [vmem:[%s4294_s5 + $0x398] sm:$0xff]  ;;  %v2079_v30 = vld [vmem:[%s4294_s5 + $0x3a8] sm:$0xff] }
  0x20   :  { %2507 = vmatpush3.msra.mxu0 %v53_v38  ;;  %v2076_v31 = vld [vmem:[%s4294_s5 + $0x390] sm:$0xff]  ;;  %v2078_v32 = vld [vmem:[%s4294_s5 + $0x3a0] sm:$0xff]  ;;  %v2071_v33 = vld [vmem:[%s4294_s5 + $0x368] sm:$0xff] }
  0x21   :  { %2508 = vmatprep.subr.mxu0 %v2571_v3  ;;  %v2073_v34 = vld [vmem:[%s4294_s5 + $0x378] sm:$0xff]  ;;  %v2070_v35 = vld [vmem:[%s4294_s5 + $0x360] sm:$0xff]  ;;  %v2072_v36 = vld [vmem:[%s4294_s5 + $0x370] sm:$0xff] }
  0x22   :  { %2509 = vmatpush3.msra.mxu0 %v52_v39  ;;  %v2065_v37 = vld [vmem:[%s4294_s5 + $0x338] sm:$0xff]  ;;  %v2067_v38 = vld [vmem:[%s4294_s5 + $0x348] sm:$0xff]  ;;  %v2064_v39 = vld [vmem:[%s4294_s5 + $0x330] sm:$0xff] }
  0x23   :  { %2511 = vmatmul.mubr.f32.vlgmr.msra.gmra.mxu0 %v68_v40  ;;  %525 = vmatprep.subr.mxu0 %v2151_v45  ;;  %v2066_v40 = vld [vmem:[%s4294_s5 + $0x340] sm:$0xff]  ;;  %v2059_v41 = vld [vmem:[%s4294_s5 + $0x308] sm:$0xff]  ;;  %v2060_v44 = vld [vmem:[%s4294_s5 + $0x310] sm:$0xff] }
  0x24   :  { %589 = vmatprep.mubr.f32.mxu0 %v2571_v3  ;;  %526 = vmatpush1.msra.mxu0 %v2150_v47  ;;  %v2153_v45 = vld [vmem:[%s4294_s5 + $0x5f8] sm:$0xff] }
  0x25   :  { %527 = vmatprep.subr.mxu0 %v2145_v49 }
  0x26   :  { %528 = vmatpush1.msra.mxu0 %v2144_v51 }
  0x27   :  { %529 = vmatprep.subr.mxu0 %v2139_v53 }
  0x28   :  { %530 = vmatpush1.msra.mxu0 %v2138_v55 }
  0x29   :  { %531 = vmatprep.subr.mxu0 %v2133_v57 }
  0x2a   :  { %532 = vmatpush1.msra.mxu0 %v2132_v59 }
  0x2b   :  { %533 = vmatprep.subr.mxu0 %v2127_v61 }
  0x2c   :  { %534 = vmatpush1.msra.mxu0 %v2126_v63 }
  0x2d   :  { %535 = vmatprep.subr.mxu0 %v2121_v1 }
  0x2e   :  { %536 = vmatpush1.msra.mxu0 %v2120_v4  ;;  %v2056_v4 = vld [vmem:[%s4292_s3] ss:$0 sm:$0xff] }
  0x2f   :  { %537 = vmatprep.subr.mxu0 %v2115_v6  ;;  %v2057_v6 = vld [vmem:[%s4293_s4] ss:$0 sm:$0xff] }
  0x30   :  { %538 = vmatpush1.msra.mxu0 %v2114_v8 }
  0x31   :  { %539 = vmatprep.subr.mxu0 %v2109_v10 }
  0x32   :  { %540 = vmatpush1.msra.mxu0 %v2108_v12  ;;  %v348_v12 = vld [vmem:[%s4294_s5 + $0x2d0] sm:$0xff] }
  0x33   :  { %541 = vmatprep.subr.mxu0 %v2103_v14  ;;  %v343_v14 = vld [vmem:[%s4294_s5 + $0x2a8] sm:$0xff] }
  0x34   :  { %542 = vmatpush1.msra.mxu0 %v2102_v16  ;;  %v342_v16 = vld [vmem:[%s4294_s5 + $0x2a0] sm:$0xff] }
  0x35   :  { %543 = vmatprep.subr.mxu0 %v2097_v18  ;;  %v337_v18 = vld [vmem:[%s4294_s5 + $0x278] sm:$0xff] }
  0x36   :  { %544 = vmatpush1.msra.mxu0 %v2096_v20  ;;  %v336_v20 = vld [vmem:[%s4294_s5 + $0x270] sm:$0xff] }
  0x37   :  { %545 = vmatprep.subr.mxu0 %v2091_v22  ;;  %v331_v22 = vld [vmem:[%s4294_s5 + $0x248] sm:$0xff] }
  0x38   :  { %546 = vmatpush1.msra.mxu0 %v2090_v24  ;;  %v330_v24 = vld [vmem:[%s4294_s5 + $0x240] sm:$0xff] }
  0x39   :  { %547 = vmatprep.subr.mxu0 %v2085_v26  ;;  %v325_v26 = vld [vmem:[%s4294_s5 + $0x218] sm:$0xff] }
  0x3a   :  { %548 = vmatpush1.msra.mxu0 %v2084_v28  ;;  %v324_v28 = vld [vmem:[%s4294_s5 + $0x210] sm:$0xff] }
  0x3b   :  { %549 = vmatprep.subr.mxu0 %v2079_v30  ;;  %v319_v30 = vld [vmem:[%s4294_s5 + $0x1e8] sm:$0xff] }
  0x3c   :  { %550 = vmatpush1.msra.mxu0 %v2078_v32  ;;  %v318_v32 = vld [vmem:[%s4294_s5 + $0x1e0] sm:$0xff] }
  0x3d   :  { %551 = vmatprep.subr.mxu0 %v2073_v34  ;;  %v313_v34 = vld [vmem:[%s4294_s5 + $0x1b8] sm:$0xff] }
  0x3e   :  { %552 = vmatpush1.msra.mxu0 %v2072_v36  ;;  %v312_v36 = vld [vmem:[%s4294_s5 + $0x1b0] sm:$0xff] }
  0x3f   :  { %553 = vmatprep.subr.mxu0 %v2067_v38  ;;  %v307_v38 = vld [vmem:[%s4294_s5 + $0x188] sm:$0xff] }
  0x40   :  { %554 = vmatpush1.msra.mxu0 %v2066_v40  ;;  %v306_v40 = vld [vmem:[%s4294_s5 + $0x180] sm:$0xff] }
  0xe3   :  { %v135_v42 = vpop.f32.mrf.mxu0 }
  0xe4   :  { %2530 = vmatmul.mubr.msk.f32.vlgmr.msra.gmra.mxu1 %vm147_vm1, %v135_v42  ;;  %v2061_v42 = vld [vmem:[%s4294_s5 + $0x318] sm:$0xff] }
  0xe5   :  { %v2512_v43 = vpop.f32.mrf.mxu0  ;;  %518 = vmatprep.mubr.f32.mxu1 %v2571_v3  ;;  %455 = vmatpush1.msra.mxu1 %v2148_v46  ;;  %v349_v46 = vld [vmem:[%s4294_s5 + $0x2d8] sm:$0xff] }
  0xe6   :  { %456 = vmatprep.subr.mxu1 %v2143_v48  ;;  %v2058_v43 = vld [vmem:[%s4294_s5 + $0x300] sm:$0xff]  ;;  %555 = vmatprep.subr.mxu0 %v2061_v42  ;;  %v301_v42 = vld [vmem:[%s4294_s5 + $0x158] sm:$0xff] }
  0xe7   :  { %457 = vmatpush1.msra.mxu1 %v2142_v50  ;;  %556 = vmatpush1.msra.mxu0 %v2060_v44  ;;  %v300_v44 = vld [vmem:[%s4294_s5 + $0x150] sm:$0xff] }
  0xe8   :  { %458 = vmatprep.subr.mxu1 %v2137_v52  ;;  %667 = vmatprep.subr.mxu0 %v349_v46  ;;  %v295_v46 = vld [vmem:[%s4294_s5 + $0x128] sm:$0xff] }
  0xe9   :  { %459 = vmatpush1.msra.mxu1 %v2136_v54 }
  0xea   :  { %460 = vmatprep.subr.mxu1 %v2131_v56 }
  0xeb   :  { %461 = vmatpush1.msra.mxu1 %v2130_v58 }
  0xec   :  { %462 = vmatprep.subr.mxu1 %v2125_v60 }
  0xed   :  { %463 = vmatpush1.msra.mxu1 %v2124_v62 }
  0xee   :  { %464 = vmatprep.subr.mxu1 %v2119_v0 }
  0xef   :  { %465 = vmatpush1.msra.mxu1 %v2118_v2 }
  0xf0   :  { %466 = vmatprep.subr.mxu1 %v2113_v5 }
  0xf1   :  { %467 = vmatpush1.msra.mxu1 %v2112_v7 }
  0xf2   :  { %468 = vmatprep.subr.mxu1 %v2107_v9 }
  0xf3   :  { %469 = vmatpush1.msra.mxu1 %v2106_v11  ;;  %v2152_v11 = vld [vmem:[%s4294_s5 + $0x5f0] sm:$0xff] }
  0xf4   :  { %470 = vmatprep.subr.mxu1 %v2101_v13  ;;  %v2147_v13 = vld [vmem:[%s4294_s5 + $0x5c8] sm:$0xff] }
  0xf5   :  { %471 = vmatpush1.msra.mxu1 %v2100_v15  ;;  %v2146_v15 = vld [vmem:[%s4294_s5 + $0x5c0] sm:$0xff] }
  0xf6   :  { %472 = vmatprep.subr.mxu1 %v2095_v17  ;;  %v2141_v17 = vld [vmem:[%s4294_s5 + $0x598] sm:$0xff] }
  0xf7   :  { %473 = vmatpush1.msra.mxu1 %v2094_v19  ;;  %v2140_v19 = vld [vmem:[%s4294_s5 + $0x590] sm:$0xff] }
  0xf8   :  { %474 = vmatprep.subr.mxu1 %v2089_v21  ;;  %v2135_v21 = vld [vmem:[%s4294_s5 + $0x568] sm:$0xff] }
  0xf9   :  { %475 = vmatpush1.msra.mxu1 %v2088_v23  ;;  %v2134_v23 = vld [vmem:[%s4294_s5 + $0x560] sm:$0xff] }
  0xfa   :  { %476 = vmatprep.subr.mxu1 %v2083_v25  ;;  %v2129_v25 = vld [vmem:[%s4294_s5 + $0x538] sm:$0xff] }
  0xfb   :  { %477 = vmatpush1.msra.mxu1 %v2082_v27  ;;  %v2128_v27 = vld [vmem:[%s4294_s5 + $0x530] sm:$0xff] }
  0xfc   :  { %478 = vmatprep.subr.mxu1 %v2077_v29  ;;  %v2123_v29 = vld [vmem:[%s4294_s5 + $0x508] sm:$0xff] }
  0xfd   :  { %479 = vmatpush1.msra.mxu1 %v2076_v31  ;;  %v2122_v31 = vld [vmem:[%s4294_s5 + $0x500] sm:$0xff] }
  0xfe   :  { %480 = vmatprep.subr.mxu1 %v2071_v33  ;;  %v2117_v33 = vld [vmem:[%s4294_s5 + $0x4d8] sm:$0xff] }
  0xff   :  { %481 = vmatpush1.msra.mxu1 %v2070_v35  ;;  %v2116_v35 = vld [vmem:[%s4294_s5 + $0x4d0] sm:$0xff] }
 0x100   :  { %482 = vmatprep.subr.mxu1 %v2065_v37  ;;  %v2111_v37 = vld [vmem:[%s4294_s5 + $0x4a8] sm:$0xff] }
 0x101   :  { %483 = vmatpush1.msra.mxu1 %v2064_v39  ;;  %v2110_v39 = vld [vmem:[%s4294_s5 + $0x4a0] sm:$0xff] }
 0x102   :  { %484 = vmatprep.subr.mxu1 %v2059_v41  ;;  %v2105_v41 = vld [vmem:[%s4294_s5 + $0x478] sm:$0xff] }
 0x103   :  { %485 = vmatpush1.msra.mxu1 %v2058_v43  ;;  %v2104_v43 = vld [vmem:[%s4294_s5 + $0x470] sm:$0xff] }
 0x104   :  { %596 = vmatprep.subr.mxu1 %v2153_v45  ;;  %v2099_v45 = vld [vmem:[%s4294_s5 + $0x448] sm:$0xff] }
 0x1a4   :  { %v217_v47 = vpop.f32.mrf.mxu1 }
 0x1a5   :  { %v221_v48 = vrot.slane %v217_v47, 4 }
 0x1a6   :  { %v2531_v49 = vpop.f32.mrf.mxu1 }
 0x1a7   :  { %v222_v50 = vadd.f32 %v221_v48, %v217_v47  ;;  %v294_v48 = vld [vmem:[%s4294_s5 + $0x120] sm:$0xff]  ;;  %v2093_v49 = vld [vmem:[%s4294_s5 + $0x418] sm:$0xff] }
 0x1a9   :  { %v223_v51 = vrot.slane %v222_v50, 2 }
 0x1ab   :  { %v224_v52 = vadd.f32 %v223_v51, %v222_v50  ;;  %v289_v50 = vld [vmem:[%s4294_s5 + $0xf8] sm:$0xff]  ;;  %v2092_v51 = vld [vmem:[%s4294_s5 + $0x410] sm:$0xff] }
 0x1ad   :  { %v225_v53 = vrot.slane %v224_v52, 1 }
 0x1af   :  { %v226_v54 = vadd.f32 %v225_v53, %v224_v52  ;;  %v288_v52 = vld [vmem:[%s4294_s5 + $0xf0] sm:$0xff]  ;;  %v2087_v53 = vld [vmem:[%s4294_s5 + $0x3e8] sm:$0xff] }
 0x1b1   :  { %v228_v55 = vmul.f32 0.125, %v226_v54  ;;  %v283_v54 = vld [vmem:[%s4294_s5 + $0xc8] sm:$0xff] }
 0x1b3   :  { %v229_v56 = vsub.f32 %v217_v47, %v228_v55  ;;  %v2098_v47 = vld [vmem:[%s4294_s5 + $0x440] sm:$0xff] }
 0x1b4   :  { %v2086_v55 = vld [vmem:[%s4294_s5 + $0x3e0] sm:$0xff] }
 0x1b5   :  { %v230_v57 = vmul.f32 %v229_v56, %v229_v56 }
 0x1b7   :  { %v231_v58 = vrot.slane %v230_v57, 4 }
 0x1b9   :  { %v232_v59 = vadd.f32 %v231_v58, %v230_v57  ;;  %v2081_v57 = vld [vmem:[%s4294_s5 + $0x3b8] sm:$0xff] }
 0x1ba   :  { %v277_v58 = vld [vmem:[%s4294_s5 + $0x98] sm:$0xff] }
 0x1bb   :  { %v233_v60 = vrot.slane %v232_v59, 2 }
 0x1bd   :  { %v234_v61 = vadd.f32 %v233_v60, %v232_v59  ;;  %v2080_v59 = vld [vmem:[%s4294_s5 + $0x3b0] sm:$0xff] }
 0x1be   :  { %v276_v60 = vld [vmem:[%s4294_s5 + $0x90] sm:$0xff] }
 0x1bf   :  { %v235_v62 = vrot.slane %v234_v61, 1 }
 0x1c1   :  { %v236_v63 = vadd.f32 %v235_v62, %v234_v61  ;;  %v2075_v61 = vld [vmem:[%s4294_s5 + $0x388] sm:$0xff] }
 0x1c2   :  { %v271_v62 = vld [vmem:[%s4294_s5 + $0x68] sm:$0xff] }
 0x1c3   :  { %v237_v0 = vmul.f32 0.125, %v236_v63  ;;  %v2074_v63 = vld [vmem:[%s4294_s5 + $0x380] sm:$0xff] }
 0x1c5   :  { %v238_v1 = vadd.f32 1e-05, %v237_v0  ;;  %v270_v0 = vld [vmem:[%s4294_s5 + $0x60] sm:$0xff] }
 0x1c7   :  { %2535 = vrsqrt.f32 %v238_v1  ;;  %v2069_v1 = vld [vmem:[%s4294_s5 + $0x358] sm:$0xff] }
 0x1d4   :  { %v2536_v2 = vpop.eup %2535 }
 0x1d5   :  { %v240_v5 = vmul.f32 %v2536_v2, %v229_v56  ;;  %v282_v56 = vld [vmem:[%s4294_s5 + $0xc0] sm:$0xff]  ;;  %v265_v2 = vld [vmem:[%s4294_s5 + $0x38] sm:$0xff] }
 0x1d7   :  { %v248_v7 = vmul.f32 %v2056_v4, %v240_v5  ;;  %v2068_v4 = vld [vmem:[%s4294_s5 + $0x350] sm:$0xff] }
 0x1d8   :  { %v264_v5 = vld [vmem:[%s4294_s5 + $0x30] sm:$0xff] }
 0x1d9   :  { %v256_v8 = vadd.f32 %v2057_v6, %v248_v7  ;;  %v2063_v6 = vld [vmem:[%s4294_s5 + $0x328] sm:$0xff] }
 0x1da   :  { %v259_v7 = vld [vmem:[%s4294_s5 + $0x8] sm:$0xff] }
 0x1db   :  { %v2936_v9 = vmax.f32 %v256_v8, 0.0  ;;  %v2062_v8 = vld [vmem:[%s4294_s5 + $0x320] sm:$0xff] }
 0x1dd   :  { %v2939_v10 = vrot.slane %v2936_v9, 2 }
 0x1df   :  { %519 = vmatmul.mubr.f32.vlgmr.msra.gmra.mxu1 %v2939_v10  ;;  %590 = vmatmul.mubr.f32.vlgmr.msra.gmra.mxu0 %v2939_v10 }
 0x1e0   :  { %597 = vmatpush1.msra.mxu1 %v2152_v11  ;;  %668 = vmatpush1.msra.mxu0 %v348_v12  ;;  %v258_v11 = vld [vmem:[%s4294_s5] sm:$0xff]  ;;  %v351_v12 = vld [vmem:[%s4294_s5 + $0x2e8] sm:$0xff] }
 0x1e1   :  { %598 = vmatprep.subr.mxu1 %v2147_v13  ;;  %669 = vmatprep.subr.mxu0 %v343_v14  ;;  %v353_v13 = vld [vmem:[%s4294_s5 + $0x2f8] sm:$0xff]  ;;  %v350_v14 = vld [vmem:[%s4294_s5 + $0x2e0] sm:$0xff] }
 0x1e2   :  { %599 = vmatpush1.msra.mxu1 %v2146_v15  ;;  %670 = vmatpush1.msra.mxu0 %v342_v16  ;;  %v352_v15 = vld [vmem:[%s4294_s5 + $0x2f0] sm:$0xff]  ;;  %v345_v16 = vld [vmem:[%s4294_s5 + $0x2b8] sm:$0xff] }
 0x1e3   :  { %600 = vmatprep.subr.mxu1 %v2141_v17  ;;  %671 = vmatprep.subr.mxu0 %v337_v18  ;;  %v347_v17 = vld [vmem:[%s4294_s5 + $0x2c8] sm:$0xff]  ;;  %v344_v18 = vld [vmem:[%s4294_s5 + $0x2b0] sm:$0xff] }
 0x1e4   :  { %601 = vmatpush1.msra.mxu1 %v2140_v19  ;;  %672 = vmatpush1.msra.mxu0 %v336_v20  ;;  %v339_v19 = vld [vmem:[%s4294_s5 + $0x288] sm:$0xff]  ;;  %v341_v20 = vld [vmem:[%s4294_s5 + $0x298] sm:$0xff] }
 0x1e5   :  { %602 = vmatprep.subr.mxu1 %v2135_v21  ;;  %673 = vmatprep.subr.mxu0 %v331_v22  ;;  %v338_v21 = vld [vmem:[%s4294_s5 + $0x280] sm:$0xff]  ;;  %v340_v22 = vld [vmem:[%s4294_s5 + $0x290] sm:$0xff] }
 0x1e6   :  { %603 = vmatpush1.msra.mxu1 %v2134_v23  ;;  %674 = vmatpush1.msra.mxu0 %v330_v24  ;;  %v333_v23 = vld [vmem:[%s4294_s5 + $0x258] sm:$0xff]  ;;  %v335_v24 = vld [vmem:[%s4294_s5 + $0x268] sm:$0xff] }
 0x1e7   :  { %604 = vmatprep.subr.mxu1 %v2129_v25  ;;  %675 = vmatprep.subr.mxu0 %v325_v26  ;;  %v332_v25 = vld [vmem:[%s4294_s5 + $0x250] sm:$0xff]  ;;  %v334_v26 = vld [vmem:[%s4294_s5 + $0x260] sm:$0xff] }
 0x1e8   :  { %605 = vmatpush1.msra.mxu1 %v2128_v27  ;;  %676 = vmatpush1.msra.mxu0 %v324_v28  ;;  %v327_v27 = vld [vmem:[%s4294_s5 + $0x228] sm:$0xff]  ;;  %v329_v28 = vld [vmem:[%s4294_s5 + $0x238] sm:$0xff] }
 0x1e9   :  { %606 = vmatprep.subr.mxu1 %v2123_v29  ;;  %677 = vmatprep.subr.mxu0 %v319_v30  ;;  %v326_v29 = vld [vmem:[%s4294_s5 + $0x220] sm:$0xff]  ;;  %v328_v30 = vld [vmem:[%s4294_s5 + $0x230] sm:$0xff] }
 0x1ea   :  { %607 = vmatpush1.msra.mxu1 %v2122_v31  ;;  %678 = vmatpush1.msra.mxu0 %v318_v32  ;;  %v321_v31 = vld [vmem:[%s4294_s5 + $0x1f8] sm:$0xff]  ;;  %v323_v32 = vld [vmem:[%s4294_s5 + $0x208] sm:$0xff] }
 0x1eb   :  { %608 = vmatprep.subr.mxu1 %v2117_v33  ;;  %679 = vmatprep.subr.mxu0 %v313_v34  ;;  %v320_v33 = vld [vmem:[%s4294_s5 + $0x1f0] sm:$0xff]  ;;  %v322_v34 = vld [vmem:[%s4294_s5 + $0x200] sm:$0xff] }
 0x1ec   :  { %609 = vmatpush1.msra.mxu1 %v2116_v35  ;;  %680 = vmatpush1.msra.mxu0 %v312_v36  ;;  %v315_v35 = vld [vmem:[%s4294_s5 + $0x1c8] sm:$0xff]  ;;  %v317_v36 = vld [vmem:[%s4294_s5 + $0x1d8] sm:$0xff] }
 0x1ed   :  { %610 = vmatprep.subr.mxu1 %v2111_v37  ;;  %681 = vmatprep.subr.mxu0 %v307_v38  ;;  %v314_v37 = vld [vmem:[%s4294_s5 + $0x1c0] sm:$0xff]  ;;  %v316_v38 = vld [vmem:[%s4294_s5 + $0x1d0] sm:$0xff] }
 0x1ee   :  { %611 = vmatpush1.msra.mxu1 %v2110_v39  ;;  %682 = vmatpush1.msra.mxu0 %v306_v40  ;;  %v309_v39 = vld [vmem:[%s4294_s5 + $0x198] sm:$0xff]  ;;  %v311_v40 = vld [vmem:[%s4294_s5 + $0x1a8] sm:$0xff] }
 0x1ef   :  { %612 = vmatprep.subr.mxu1 %v2105_v41  ;;  %683 = vmatprep.subr.mxu0 %v301_v42  ;;  %v308_v41 = vld [vmem:[%s4294_s5 + $0x190] sm:$0xff]  ;;  %v310_v42 = vld [vmem:[%s4294_s5 + $0x1a0] sm:$0xff] }
 0x1f0   :  { %613 = vmatpush1.msra.mxu1 %v2104_v43  ;;  %684 = vmatpush1.msra.mxu0 %v300_v44  ;;  %v303_v43 = vld [vmem:[%s4294_s5 + $0x168] sm:$0xff]  ;;  %v305_v44 = vld [vmem:[%s4294_s5 + $0x178] sm:$0xff] }
 0x1f1   :  { %614 = vmatprep.subr.mxu1 %v2099_v45  ;;  %685 = vmatprep.subr.mxu0 %v295_v46  ;;  %v302_v45 = vld [vmem:[%s4294_s5 + $0x160] sm:$0xff]  ;;  %v304_v46 = vld [vmem:[%s4294_s5 + $0x170] sm:$0xff] }
 0x1f2   :  { %615 = vmatpush1.msra.mxu1 %v2098_v47  ;;  %686 = vmatpush1.msra.mxu0 %v294_v48  ;;  %v297_v47 = vld [vmem:[%s4294_s5 + $0x138] sm:$0xff]  ;;  %v299_v48 = vld [vmem:[%s4294_s5 + $0x148] sm:$0xff] }
 0x1f3   :  { %616 = vmatprep.subr.mxu1 %v2093_v49  ;;  %687 = vmatprep.subr.mxu0 %v289_v50  ;;  %v296_v49 = vld [vmem:[%s4294_s5 + $0x130] sm:$0xff]  ;;  %v298_v50 = vld [vmem:[%s4294_s5 + $0x140] sm:$0xff] }
 0x1f4   :  { %617 = vmatpush1.msra.mxu1 %v2092_v51  ;;  %688 = vmatpush1.msra.mxu0 %v288_v52  ;;  %v291_v51 = vld [vmem:[%s4294_s5 + $0x108] sm:$0xff]  ;;  %v293_v52 = vld [vmem:[%s4294_s5 + $0x118] sm:$0xff] }
 0x1f5   :  { %618 = vmatprep.subr.mxu1 %v2087_v53  ;;  %689 = vmatprep.subr.mxu0 %v283_v54  ;;  %v290_v53 = vld [vmem:[%s4294_s5 + $0x100] sm:$0xff]  ;;  %v292_v54 = vld [vmem:[%s4294_s5 + $0x110] sm:$0xff] }
 0x1f6   :  { %619 = vmatpush1.msra.mxu1 %v2086_v55  ;;  %690 = vmatpush1.msra.mxu0 %v282_v56  ;;  %v285_v55 = vld [vmem:[%s4294_s5 + $0xd8] sm:$0xff]  ;;  %v287_v56 = vld [vmem:[%s4294_s5 + $0xe8] sm:$0xff] }
 0x1f7   :  { %620 = vmatprep.subr.mxu1 %v2081_v57  ;;  %691 = vmatprep.subr.mxu0 %v277_v58  ;;  %v284_v57 = vld [vmem:[%s4294_s5 + $0xd0] sm:$0xff]  ;;  %v286_v58 = vld [vmem:[%s4294_s5 + $0xe0] sm:$0xff] }
 0x1f8   :  { %621 = vmatpush1.msra.mxu1 %v2080_v59  ;;  %692 = vmatpush1.msra.mxu0 %v276_v60  ;;  %v279_v59 = vld [vmem:[%s4294_s5 + $0xa8] sm:$0xff]  ;;  %v281_v60 = vld [vmem:[%s4294_s5 + $0xb8] sm:$0xff] }
 0x1f9   :  { %622 = vmatprep.subr.mxu1 %v2075_v61  ;;  %693 = vmatprep.subr.mxu0 %v271_v62  ;;  %v278_v61 = vld [vmem:[%s4294_s5 + $0xa0] sm:$0xff]  ;;  %v280_v62 = vld [vmem:[%s4294_s5 + $0xb0] sm:$0xff] }
 0x1fa   :  { %623 = vmatpush1.msra.mxu1 %v2074_v63  ;;  %694 = vmatpush1.msra.mxu0 %v270_v0  ;;  %v273_v63 = vld [vmem:[%s4294_s5 + $0x78] sm:$0xff]  ;;  %v275_v0 = vld [vmem:[%s4294_s5 + $0x88] sm:$0xff] }
 0x1fb   :  { %624 = vmatprep.subr.mxu1 %v2069_v1  ;;  %695 = vmatprep.subr.mxu0 %v265_v2  ;;  %v272_v1 = vld [vmem:[%s4294_s5 + $0x70] sm:$0xff]  ;;  %v274_v2 = vld [vmem:[%s4294_s5 + $0x80] sm:$0xff] }
 0x1fc   :  { %625 = vmatpush1.msra.mxu1 %v2068_v4  ;;  %696 = vmatpush1.msra.mxu0 %v264_v5  ;;  %v267_v4 = vld [vmem:[%s4294_s5 + $0x48] sm:$0xff]  ;;  %v269_v5 = vld [vmem:[%s4294_s5 + $0x58] sm:$0xff] }
 0x1fd   :  { %626 = vmatprep.subr.mxu1 %v2063_v6  ;;  %697 = vmatprep.subr.mxu0 %v259_v7  ;;  %v266_v6 = vld [vmem:[%s4294_s5 + $0x40] sm:$0xff]  ;;  %v268_v7 = vld [vmem:[%s4294_s5 + $0x50] sm:$0xff] }
 0x1fe   :  { %627 = vmatpush1.msra.mxu1 %v2062_v8  ;;  %660 = vmatprep.mubr.f32.mxu1 %v2571_v3  ;;  %v261_v8 = vld [vmem:[%s4294_s5 + $0x18] sm:$0xff] }
 0x1ff   :  { %698 = vmatpush1.msra.mxu0 %v258_v11  ;;  %731 = vmatprep.mubr.f32.mxu0 %v2571_v3  ;;  %v263_v11 = vld [vmem:[%s4294_s5 + $0x28] sm:$0xff] }
 0x200   :  { %661 = vmatmul.mubr.f32.vlgmr.msra.gmra.mxu1 %v2939_v10  ;;  %732 = vmatmul.mubr.f32.vlgmr.msra.gmra.mxu0 %v2936_v9  ;;  %v346_v10 = vld [vmem:[%s4294_s5 + $0x2c0] sm:$0xff] }
 0x201   :  { %738 = vmatprep.subr.mxu1 %v351_v12  ;;  %809 = vmatprep.subr.mxu0 %v353_v13  ;;  %v260_v12 = vld [vmem:[%s4294_s5 + $0x10] sm:$0xff]  ;;  %v262_v13 = vld [vmem:[%s4294_s5 + $0x20] sm:$0xff] }
 0x202   :  { %739 = vmatpush1.msra.mxu1 %v350_v14  ;;  %810 = vmatpush1.msra.mxu0 %v352_v15  ;;  %v2245_v14 = vld [vmem:[%s4294_s5 + $0x8d8] sm:$0xff]  ;;  %v2247_v15 = vld [vmem:[%s4294_s5 + $0x8e8] sm:$0xff] }
 0x203   :  { %740 = vmatprep.subr.mxu1 %v345_v16  ;;  %811 = vmatprep.subr.mxu0 %v347_v17  ;;  %v2244_v16 = vld [vmem:[%s4294_s5 + $0x8d0] sm:$0xff]  ;;  %v2246_v17 = vld [vmem:[%s4294_s5 + $0x8e0] sm:$0xff] }
 0x204   :  { %741 = vmatpush1.msra.mxu1 %v344_v18  ;;  %812 = vmatpush1.msra.mxu0 %v346_v10  ;;  %v2239_v18 = vld [vmem:[%s4294_s5 + $0x8a8] sm:$0xff]  ;;  %v2241_v10 = vld [vmem:[%s4294_s5 + $0x8b8] sm:$0xff] }
 0x205   :  { %742 = vmatprep.subr.mxu1 %v339_v19  ;;  %813 = vmatprep.subr.mxu0 %v341_v20  ;;  %v2238_v19 = vld [vmem:[%s4294_s5 + $0x8a0] sm:$0xff]  ;;  %v2240_v20 = vld [vmem:[%s4294_s5 + $0x8b0] sm:$0xff] }
 0x206   :  { %743 = vmatpush1.msra.mxu1 %v338_v21  ;;  %814 = vmatpush1.msra.mxu0 %v340_v22  ;;  %v2233_v21 = vld [vmem:[%s4294_s5 + $0x878] sm:$0xff]  ;;  %v2235_v22 = vld [vmem:[%s4294_s5 + $0x888] sm:$0xff] }
 0x207   :  { %744 = vmatprep.subr.mxu1 %v333_v23  ;;  %815 = vmatprep.subr.mxu0 %v335_v24  ;;  %v2232_v23 = vld [vmem:[%s4294_s5 + $0x870] sm:$0xff]  ;;  %v2234_v24 = vld [vmem:[%s4294_s5 + $0x880] sm:$0xff] }
 0x208   :  { %745 = vmatpush1.msra.mxu1 %v332_v25  ;;  %816 = vmatpush1.msra.mxu0 %v334_v26  ;;  %v2227_v25 = vld [vmem:[%s4294_s5 + $0x848] sm:$0xff]  ;;  %v2229_v26 = vld [vmem:[%s4294_s5 + $0x858] sm:$0xff] }
 0x209   :  { %746 = vmatprep.subr.mxu1 %v327_v27  ;;  %817 = vmatprep.subr.mxu0 %v329_v28  ;;  %v2226_v27 = vld [vmem:[%s4294_s5 + $0x840] sm:$0xff]  ;;  %v2228_v28 = vld [vmem:[%s4294_s5 + $0x850] sm:$0xff] }
 0x20a   :  { %747 = vmatpush1.msra.mxu1 %v326_v29  ;;  %818 = vmatpush1.msra.mxu0 %v328_v30  ;;  %v2221_v29 = vld [vmem:[%s4294_s5 + $0x818] sm:$0xff]  ;;  %v2223_v30 = vld [vmem:[%s4294_s5 + $0x828] sm:$0xff] }
 0x20b   :  { %748 = vmatprep.subr.mxu1 %v321_v31  ;;  %819 = vmatprep.subr.mxu0 %v323_v32  ;;  %v2220_v31 = vld [vmem:[%s4294_s5 + $0x810] sm:$0xff]  ;;  %v2222_v32 = vld [vmem:[%s4294_s5 + $0x820] sm:$0xff] }
 0x20c   :  { %749 = vmatpush1.msra.mxu1 %v320_v33  ;;  %820 = vmatpush1.msra.mxu0 %v322_v34  ;;  %v2215_v33 = vld [vmem:[%s4294_s5 + $0x7e8] sm:$0xff]  ;;  %v2217_v34 = vld [vmem:[%s4294_s5 + $0x7f8] sm:$0xff] }
 0x20d   :  { %750 = vmatprep.subr.mxu1 %v315_v35  ;;  %821 = vmatprep.subr.mxu0 %v317_v36  ;;  %v2214_v35 = vld [vmem:[%s4294_s5 + $0x7e0] sm:$0xff]  ;;  %v2216_v36 = vld [vmem:[%s4294_s5 + $0x7f0] sm:$0xff] }
 0x20e   :  { %751 = vmatpush1.msra.mxu1 %v314_v37  ;;  %822 = vmatpush1.msra.mxu0 %v316_v38  ;;  %v2209_v37 = vld [vmem:[%s4294_s5 + $0x7b8] sm:$0xff]  ;;  %v2211_v38 = vld [vmem:[%s4294_s5 + $0x7c8] sm:$0xff] }
 0x20f   :  { %752 = vmatprep.subr.mxu1 %v309_v39  ;;  %823 = vmatprep.subr.mxu0 %v311_v40  ;;  %v2208_v39 = vld [vmem:[%s4294_s5 + $0x7b0] sm:$0xff]  ;;  %v2210_v40 = vld [vmem:[%s4294_s5 + $0x7c0] sm:$0xff] }
 0x210   :  { %753 = vmatpush1.msra.mxu1 %v308_v41  ;;  %824 = vmatpush1.msra.mxu0 %v310_v42  ;;  %v2203_v41 = vld [vmem:[%s4294_s5 + $0x788] sm:$0xff]  ;;  %v2205_v42 = vld [vmem:[%s4294_s5 + $0x798] sm:$0xff] }
 0x211   :  { %754 = vmatprep.subr.mxu1 %v303_v43  ;;  %825 = vmatprep.subr.mxu0 %v305_v44  ;;  %v2202_v43 = vld [vmem:[%s4294_s5 + $0x780] sm:$0xff]  ;;  %v2204_v44 = vld [vmem:[%s4294_s5 + $0x790] sm:$0xff] }
 0x212   :  { %755 = vmatpush1.msra.mxu1 %v302_v45  ;;  %826 = vmatpush1.msra.mxu0 %v304_v46  ;;  %v2197_v45 = vld [vmem:[%s4294_s5 + $0x758] sm:$0xff]  ;;  %v2199_v46 = vld [vmem:[%s4294_s5 + $0x768] sm:$0xff] }
 0x213   :  { %756 = vmatprep.subr.mxu1 %v297_v47  ;;  %827 = vmatprep.subr.mxu0 %v299_v48  ;;  %v2196_v47 = vld [vmem:[%s4294_s5 + $0x750] sm:$0xff]  ;;  %v2198_v48 = vld [vmem:[%s4294_s5 + $0x760] sm:$0xff] }
 0x214   :  { %757 = vmatpush1.msra.mxu1 %v296_v49  ;;  %828 = vmatpush1.msra.mxu0 %v298_v50  ;;  %v2191_v49 = vld [vmem:[%s4294_s5 + $0x728] sm:$0xff]  ;;  %v2193_v50 = vld [vmem:[%s4294_s5 + $0x738] sm:$0xff] }
 0x215   :  { %758 = vmatprep.subr.mxu1 %v291_v51  ;;  %829 = vmatprep.subr.mxu0 %v293_v52  ;;  %v2190_v51 = vld [vmem:[%s4294_s5 + $0x720] sm:$0xff]  ;;  %v2192_v52 = vld [vmem:[%s4294_s5 + $0x730] sm:$0xff] }
 0x216   :  { %759 = vmatpush1.msra.mxu1 %v290_v53  ;;  %830 = vmatpush1.msra.mxu0 %v292_v54  ;;  %v2185_v53 = vld [vmem:[%s4294_s5 + $0x6f8] sm:$0xff]  ;;  %v2187_v54 = vld [vmem:[%s4294_s5 + $0x708] sm:$0xff] }
 0x217   :  { %760 = vmatprep.subr.mxu1 %v285_v55  ;;  %831 = vmatprep.subr.mxu0 %v287_v56  ;;  %v2184_v55 = vld [vmem:[%s4294_s5 + $0x6f0] sm:$0xff]  ;;  %v2186_v56 = vld [vmem:[%s4294_s5 + $0x700] sm:$0xff] }
 0x218   :  { %761 = vmatpush1.msra.mxu1 %v284_v57  ;;  %832 = vmatpush1.msra.mxu0 %v286_v58  ;;  %v2179_v57 = vld [vmem:[%s4294_s5 + $0x6c8] sm:$0xff]  ;;  %v2181_v58 = vld [vmem:[%s4294_s5 + $0x6d8] sm:$0xff] }
 0x219   :  { %762 = vmatprep.subr.mxu1 %v279_v59  ;;  %833 = vmatprep.subr.mxu0 %v281_v60  ;;  %v2178_v59 = vld [vmem:[%s4294_s5 + $0x6c0] sm:$0xff]  ;;  %v2180_v60 = vld [vmem:[%s4294_s5 + $0x6d0] sm:$0xff] }
 0x21a   :  { %763 = vmatpush1.msra.mxu1 %v278_v61  ;;  %834 = vmatpush1.msra.mxu0 %v280_v62  ;;  %v2173_v61 = vld [vmem:[%s4294_s5 + $0x698] sm:$0xff]  ;;  %v2175_v62 = vld [vmem:[%s4294_s5 + $0x6a8] sm:$0xff] }
 0x21b   :  { %764 = vmatprep.subr.mxu1 %v273_v63  ;;  %835 = vmatprep.subr.mxu0 %v275_v0  ;;  %v2172_v63 = vld [vmem:[%s4294_s5 + $0x690] sm:$0xff]  ;;  %v2174_v0 = vld [vmem:[%s4294_s5 + $0x6a0] sm:$0xff] }
 0x21c   :  { %765 = vmatpush1.msra.mxu1 %v272_v1  ;;  %836 = vmatpush1.msra.mxu0 %v274_v2  ;;  %v2167_v1 = vld [vmem:[%s4294_s5 + $0x668] sm:$0xff]  ;;  %v2169_v2 = vld [vmem:[%s4294_s5 + $0x678] sm:$0xff] }
 0x21d   :  { %766 = vmatprep.subr.mxu1 %v267_v4  ;;  %837 = vmatprep.subr.mxu0 %v269_v5  ;;  %v2166_v4 = vld [vmem:[%s4294_s5 + $0x660] sm:$0xff]  ;;  %v2168_v5 = vld [vmem:[%s4294_s5 + $0x670] sm:$0xff] }
 0x21e   :  { %767 = vmatpush1.msra.mxu1 %v266_v6  ;;  %838 = vmatpush1.msra.mxu0 %v268_v7  ;;  %v2161_v6 = vld [vmem:[%s4294_s5 + $0x638] sm:$0xff]  ;;  %v2163_v7 = vld [vmem:[%s4294_s5 + $0x648] sm:$0xff] }
 0x21f   :  { %768 = vmatprep.subr.mxu1 %v261_v8  ;;  %839 = vmatprep.subr.mxu0 %v263_v11  ;;  %v2160_v8 = vld [vmem:[%s4294_s5 + $0x630] sm:$0xff]  ;;  %v2162_v11 = vld [vmem:[%s4294_s5 + $0x640] sm:$0xff] }
 0x220   :  { %769 = vmatpush1.msra.mxu1 %v260_v12  ;;  %802 = vmatprep.mubr.f32.mxu1 %v2571_v3  ;;  %v2155_v12 = vld [vmem:[%s4294_s5 + $0x608] sm:$0xff] }
 0x221   :  { %840 = vmatpush1.msra.mxu0 %v262_v13  ;;  %873 = vmatprep.mubr.f32.mxu0 %v2571_v3  ;;  %v2157_v13 = vld [vmem:[%s4294_s5 + $0x618] sm:$0xff] }
 0x222   :  { %803 = vmatmul.mubr.f32.vlgmr.msra.gmra.mxu1 %v2936_v9  ;;  %874 = vmatmul.mubr.f32.vlgmr.msra.gmra.mxu0 %v2936_v9 }
 0x223   :  { %979 = vmatprep.subr.mxu1 %v2245_v14  ;;  %1050 = vmatprep.subr.mxu0 %v2247_v15  ;;  %v2154_v14 = vld [vmem:[%s4294_s5 + $0x600] sm:$0xff]  ;;  %v2156_v15 = vld [vmem:[%s4294_s5 + $0x610] sm:$0xff] }
 0x224   :  { %980 = vmatpush1.msra.mxu1 %v2244_v16  ;;  %1051 = vmatpush1.msra.mxu0 %v2246_v17  ;;  %v3523_v16 = vrot.slane %v2936_v9, 4  ;;  %v2249_v17 = vld [vmem:[%s4294_s5 + $0x8f8] sm:$0xff] }
 0x225   :  { %981 = vmatprep.subr.mxu1 %v2239_v18  ;;  %1052 = vmatprep.subr.mxu0 %v2241_v10  ;;  %v2341_v18 = vld [vmem:[%s4294_s5 + $0xbd8] sm:$0xff]  ;;  %v2248_v10 = vld [vmem:[%s4294_s5 + $0x8f0] sm:$0xff] }
 0x226   :  { %982 = vmatpush1.msra.mxu1 %v2238_v19  ;;  %1053 = vmatpush1.msra.mxu0 %v2240_v20  ;;  %v2340_v19 = vld [vmem:[%s4294_s5 + $0xbd0] sm:$0xff]  ;;  %v2243_v20 = vld [vmem:[%s4294_s5 + $0x8c8] sm:$0xff] }
 0x227   :  { %983 = vmatprep.subr.mxu1 %v2233_v21  ;;  %1054 = vmatprep.subr.mxu0 %v2235_v22  ;;  %v2335_v21 = vld [vmem:[%s4294_s5 + $0xba8] sm:$0xff]  ;;  %v2242_v22 = vld [vmem:[%s4294_s5 + $0x8c0] sm:$0xff] }
 0x228   :  { %984 = vmatpush1.msra.mxu1 %v2232_v23  ;;  %1055 = vmatpush1.msra.mxu0 %v2234_v24  ;;  %v2334_v23 = vld [vmem:[%s4294_s5 + $0xba0] sm:$0xff]  ;;  %v2237_v24 = vld [vmem:[%s4294_s5 + $0x898] sm:$0xff] }
 0x229   :  { %985 = vmatprep.subr.mxu1 %v2227_v25  ;;  %1056 = vmatprep.subr.mxu0 %v2229_v26  ;;  %v2329_v25 = vld [vmem:[%s4294_s5 + $0xb78] sm:$0xff]  ;;  %v2236_v26 = vld [vmem:[%s4294_s5 + $0x890] sm:$0xff] }
 0x22a   :  { %986 = vmatpush1.msra.mxu1 %v2226_v27  ;;  %1057 = vmatpush1.msra.mxu0 %v2228_v28  ;;  %v2328_v27 = vld [vmem:[%s4294_s5 + $0xb70] sm:$0xff]  ;;  %v2231_v28 = vld [vmem:[%s4294_s5 + $0x868] sm:$0xff] }
 0x22b   :  { %987 = vmatprep.subr.mxu1 %v2221_v29  ;;  %1058 = vmatprep.subr.mxu0 %v2223_v30  ;;  %v2323_v29 = vld [vmem:[%s4294_s5 + $0xb48] sm:$0xff]  ;;  %v2230_v30 = vld [vmem:[%s4294_s5 + $0x860] sm:$0xff] }
 0x22c   :  { %988 = vmatpush1.msra.mxu1 %v2220_v31  ;;  %1059 = vmatpush1.msra.mxu0 %v2222_v32  ;;  %v2322_v31 = vld [vmem:[%s4294_s5 + $0xb40] sm:$0xff]  ;;  %v2225_v32 = vld [vmem:[%s4294_s5 + $0x838] sm:$0xff] }
 0x22d   :  { %989 = vmatprep.subr.mxu1 %v2215_v33  ;;  %1060 = vmatprep.subr.mxu0 %v2217_v34  ;;  %v2317_v33 = vld [vmem:[%s4294_s5 + $0xb18] sm:$0xff]  ;;  %v2224_v34 = vld [vmem:[%s4294_s5 + $0x830] sm:$0xff] }
 0x22e   :  { %990 = vmatpush1.msra.mxu1 %v2214_v35  ;;  %1061 = vmatpush1.msra.mxu0 %v2216_v36  ;;  %v2316_v35 = vld [vmem:[%s4294_s5 + $0xb10] sm:$0xff]  ;;  %v2219_v36 = vld [vmem:[%s4294_s5 + $0x808] sm:$0xff] }
 0x22f   :  { %991 = vmatprep.subr.mxu1 %v2209_v37  ;;  %1062 = vmatprep.subr.mxu0 %v2211_v38  ;;  %v2311_v37 = vld [vmem:[%s4294_s5 + $0xae8] sm:$0xff]  ;;  %v2218_v38 = vld [vmem:[%s4294_s5 + $0x800] sm:$0xff] }
 0x230   :  { %992 = vmatpush1.msra.mxu1 %v2208_v39  ;;  %1063 = vmatpush1.msra.mxu0 %v2210_v40  ;;  %v2310_v39 = vld [vmem:[%s4294_s5 + $0xae0] sm:$0xff]  ;;  %v2213_v40 = vld [vmem:[%s4294_s5 + $0x7d8] sm:$0xff] }
 0x231   :  { %993 = vmatprep.subr.mxu1 %v2203_v41  ;;  %1064 = vmatprep.subr.mxu0 %v2205_v42  ;;  %v2305_v41 = vld [vmem:[%s4294_s5 + $0xab8] sm:$0xff]  ;;  %v2212_v42 = vld [vmem:[%s4294_s5 + $0x7d0] sm:$0xff] }
 0x232   :  { %994 = vmatpush1.msra.mxu1 %v2202_v43  ;;  %1065 = vmatpush1.msra.mxu0 %v2204_v44  ;;  %v2304_v43 = vld [vmem:[%s4294_s5 + $0xab0] sm:$0xff]  ;;  %v2207_v44 = vld [vmem:[%s4294_s5 + $0x7a8] sm:$0xff] }
 0x233   :  { %995 = vmatprep.subr.mxu1 %v2197_v45  ;;  %1066 = vmatprep.subr.mxu0 %v2199_v46  ;;  %v2299_v45 = vld [vmem:[%s4294_s5 + $0xa88] sm:$0xff]  ;;  %v2206_v46 = vld [vmem:[%s4294_s5 + $0x7a0] sm:$0xff] }
 0x234   :  { %996 = vmatpush1.msra.mxu1 %v2196_v47  ;;  %1067 = vmatpush1.msra.mxu0 %v2198_v48  ;;  %v2298_v47 = vld [vmem:[%s4294_s5 + $0xa80] sm:$0xff]  ;;  %v2201_v48 = vld [vmem:[%s4294_s5 + $0x778] sm:$0xff] }
 0x235   :  { %997 = vmatprep.subr.mxu1 %v2191_v49  ;;  %1068 = vmatprep.subr.mxu0 %v2193_v50  ;;  %v2293_v49 = vld [vmem:[%s4294_s5 + $0xa58] sm:$0xff]  ;;  %v2200_v50 = vld [vmem:[%s4294_s5 + $0x770] sm:$0xff] }
 0x236   :  { %998 = vmatpush1.msra.mxu1 %v2190_v51  ;;  %1069 = vmatpush1.msra.mxu0 %v2192_v52  ;;  %v2292_v51 = vld [vmem:[%s4294_s5 + $0xa50] sm:$0xff]  ;;  %v2195_v52 = vld [vmem:[%s4294_s5 + $0x748] sm:$0xff] }
 0x237   :  { %999 = vmatprep.subr.mxu1 %v2185_v53  ;;  %1070 = vmatprep.subr.mxu0 %v2187_v54  ;;  %v2287_v53 = vld [vmem:[%s4294_s5 + $0xa28] sm:$0xff]  ;;  %v2194_v54 = vld [vmem:[%s4294_s5 + $0x740] sm:$0xff] }
 0x238   :  { %1000 = vmatpush1.msra.mxu1 %v2184_v55  ;;  %1071 = vmatpush1.msra.mxu0 %v2186_v56  ;;  %v2286_v55 = vld [vmem:[%s4294_s5 + $0xa20] sm:$0xff]  ;;  %v2189_v56 = vld [vmem:[%s4294_s5 + $0x718] sm:$0xff] }
 0x239   :  { %1001 = vmatprep.subr.mxu1 %v2179_v57  ;;  %1072 = vmatprep.subr.mxu0 %v2181_v58  ;;  %v2281_v57 = vld [vmem:[%s4294_s5 + $0x9f8] sm:$0xff]  ;;  %v2188_v58 = vld [vmem:[%s4294_s5 + $0x710] sm:$0xff] }
 0x23a   :  { %1002 = vmatpush1.msra.mxu1 %v2178_v59  ;;  %1073 = vmatpush1.msra.mxu0 %v2180_v60  ;;  %v2280_v59 = vld [vmem:[%s4294_s5 + $0x9f0] sm:$0xff]  ;;  %v2183_v60 = vld [vmem:[%s4294_s5 + $0x6e8] sm:$0xff] }
 0x23b   :  { %1003 = vmatprep.subr.mxu1 %v2173_v61  ;;  %1074 = vmatprep.subr.mxu0 %v2175_v62  ;;  %v2275_v61 = vld [vmem:[%s4294_s5 + $0x9c8] sm:$0xff]  ;;  %v2182_v62 = vld [vmem:[%s4294_s5 + $0x6e0] sm:$0xff] }
 0x23c   :  { %1004 = vmatpush1.msra.mxu1 %v2172_v63  ;;  %1075 = vmatpush1.msra.mxu0 %v2174_v0  ;;  %v2274_v63 = vld [vmem:[%s4294_s5 + $0x9c0] sm:$0xff]  ;;  %v2177_v0 = vld [vmem:[%s4294_s5 + $0x6b8] sm:$0xff] }
 0x23d   :  { %1005 = vmatprep.subr.mxu1 %v2167_v1  ;;  %1076 = vmatprep.subr.mxu0 %v2169_v2  ;;  %v2269_v1 = vld [vmem:[%s4294_s5 + $0x998] sm:$0xff]  ;;  %v2176_v2 = vld [vmem:[%s4294_s5 + $0x6b0] sm:$0xff] }
 0x23e   :  { %1006 = vmatpush1.msra.mxu1 %v2166_v4  ;;  %1077 = vmatpush1.msra.mxu0 %v2168_v5  ;;  %v2268_v4 = vld [vmem:[%s4294_s5 + $0x990] sm:$0xff]  ;;  %v2171_v5 = vld [vmem:[%s4294_s5 + $0x688] sm:$0xff] }
 0x23f   :  { %1007 = vmatprep.subr.mxu1 %v2161_v6  ;;  %1078 = vmatprep.subr.mxu0 %v2163_v7  ;;  %v2263_v6 = vld [vmem:[%s4294_s5 + $0x968] sm:$0xff]  ;;  %v2170_v7 = vld [vmem:[%s4294_s5 + $0x680] sm:$0xff] }
 0x240   :  { %1008 = vmatpush1.msra.mxu1 %v2160_v8  ;;  %1079 = vmatpush1.msra.mxu0 %v2162_v11  ;;  %v2262_v8 = vld [vmem:[%s4294_s5 + $0x960] sm:$0xff]  ;;  %v2165_v11 = vld [vmem:[%s4294_s5 + $0x658] sm:$0xff] }
 0x241   :  { %1009 = vmatprep.subr.mxu1 %v2155_v12  ;;  %1080 = vmatprep.subr.mxu0 %v2157_v13  ;;  %v2257_v12 = vld [vmem:[%s4294_s5 + $0x938] sm:$0xff]  ;;  %v2164_v13 = vld [vmem:[%s4294_s5 + $0x650] sm:$0xff] }
 0x242   :  { %1010 = vmatpush1.msra.mxu1 %v2154_v14  ;;  %1043 = vmatprep.mubr.f32.mxu1 %v2571_v3  ;;  %v2256_v14 = vld [vmem:[%s4294_s5 + $0x930] sm:$0xff] }
 0x243   :  { %1081 = vmatpush1.msra.mxu0 %v2156_v15  ;;  %1114 = vmatprep.mubr.f32.mxu0 %v2571_v3  ;;  %v2159_v15 = vld [vmem:[%s4294_s5 + $0x628] sm:$0xff] }
 0x244   :  { %1044 = vmatmul.mubr.f32.vlgmr.msra.gmra.mxu1 %v3523_v16  ;;  %1115 = vmatmul.mubr.f32.vlgmr.msra.gmra.mxu0 %v3523_v16 }
 0x245   :  { %1121 = vmatprep.subr.mxu1 %v2249_v17  ;;  %1297 = vmatprep.subr.mxu0 %v2341_v18  ;;  %v2251_v17 = vld [vmem:[%s4294_s5 + $0x908] sm:$0xff]  ;;  %v2158_v18 = vld [vmem:[%s4294_s5 + $0x620] sm:$0xff] }
 0x246   :  { %1122 = vmatpush1.msra.mxu1 %v2248_v10  ;;  %1298 = vmatpush1.msra.mxu0 %v2340_v19  ;;  %v2250_v10 = vld [vmem:[%s4294_s5 + $0x900] sm:$0xff]  ;;  %v3722_v19 = vrot.slane %v2936_v9, 6  ;;  %v2344_v9 = vld [vmem:[%s4294_s5 + $0xbf0] sm:$0xff] }
 0x247   :  { %1123 = vmatprep.subr.mxu1 %v2243_v20  ;;  %1299 = vmatprep.subr.mxu0 %v2335_v21  ;;  %v2343_v20 = vld [vmem:[%s4294_s5 + $0xbe8] sm:$0xff]  ;;  %v2345_v21 = vld [vmem:[%s4294_s5 + $0xbf8] sm:$0xff] }
 0x248   :  { %1124 = vmatpush1.msra.mxu1 %v2242_v22  ;;  %1300 = vmatpush1.msra.mxu0 %v2334_v23  ;;  %v2342_v22 = vld [vmem:[%s4294_s5 + $0xbe0] sm:$0xff]  ;;  %v2337_v23 = vld [vmem:[%s4294_s5 + $0xbb8] sm:$0xff] }
 0x249   :  { %1125 = vmatprep.subr.mxu1 %v2237_v24  ;;  %1301 = vmatprep.subr.mxu0 %v2329_v25  ;;  %v2339_v24 = vld [vmem:[%s4294_s5 + $0xbc8] sm:$0xff]  ;;  %v2336_v25 = vld [vmem:[%s4294_s5 + $0xbb0] sm:$0xff] }
 0x24a   :  { %1126 = vmatpush1.msra.mxu1 %v2236_v26  ;;  %1302 = vmatpush1.msra.mxu0 %v2328_v27  ;;  %v2331_v26 = vld [vmem:[%s4294_s5 + $0xb88] sm:$0xff]  ;;  %v2333_v27 = vld [vmem:[%s4294_s5 + $0xb98] sm:$0xff] }
 0x24b   :  { %1127 = vmatprep.subr.mxu1 %v2231_v28  ;;  %1303 = vmatprep.subr.mxu0 %v2323_v29  ;;  %v2330_v28 = vld [vmem:[%s4294_s5 + $0xb80] sm:$0xff]  ;;  %v2332_v29 = vld [vmem:[%s4294_s5 + $0xb90] sm:$0xff] }
 0x24c   :  { %1128 = vmatpush1.msra.mxu1 %v2230_v30  ;;  %1304 = vmatpush1.msra.mxu0 %v2322_v31  ;;  %v2325_v30 = vld [vmem:[%s4294_s5 + $0xb58] sm:$0xff]  ;;  %v2327_v31 = vld [vmem:[%s4294_s5 + $0xb68] sm:$0xff] }
 0x24d   :  { %1129 = vmatprep.subr.mxu1 %v2225_v32  ;;  %1305 = vmatprep.subr.mxu0 %v2317_v33  ;;  %v2324_v32 = vld [vmem:[%s4294_s5 + $0xb50] sm:$0xff]  ;;  %v2326_v33 = vld [vmem:[%s4294_s5 + $0xb60] sm:$0xff] }
 0x24e   :  { %1130 = vmatpush1.msra.mxu1 %v2224_v34  ;;  %1306 = vmatpush1.msra.mxu0 %v2316_v35  ;;  %v2319_v34 = vld [vmem:[%s4294_s5 + $0xb28] sm:$0xff]  ;;  %v2321_v35 = vld [vmem:[%s4294_s5 + $0xb38] sm:$0xff] }
 0x24f   :  { %1131 = vmatprep.subr.mxu1 %v2219_v36  ;;  %1307 = vmatprep.subr.mxu0 %v2311_v37  ;;  %v2318_v36 = vld [vmem:[%s4294_s5 + $0xb20] sm:$0xff]  ;;  %v2320_v37 = vld [vmem:[%s4294_s5 + $0xb30] sm:$0xff] }
 0x250   :  { %1132 = vmatpush1.msra.mxu1 %v2218_v38  ;;  %1308 = vmatpush1.msra.mxu0 %v2310_v39  ;;  %v2313_v38 = vld [vmem:[%s4294_s5 + $0xaf8] sm:$0xff]  ;;  %v2315_v39 = vld [vmem:[%s4294_s5 + $0xb08] sm:$0xff] }
 0x251   :  { %1133 = vmatprep.subr.mxu1 %v2213_v40  ;;  %1309 = vmatprep.subr.mxu0 %v2305_v41  ;;  %v2312_v40 = vld [vmem:[%s4294_s5 + $0xaf0] sm:$0xff]  ;;  %v2314_v41 = vld [vmem:[%s4294_s5 + $0xb00] sm:$0xff] }
 0x252   :  { %1134 = vmatpush1.msra.mxu1 %v2212_v42  ;;  %1310 = vmatpush1.msra.mxu0 %v2304_v43  ;;  %v2307_v42 = vld [vmem:[%s4294_s5 + $0xac8] sm:$0xff]  ;;  %v2309_v43 = vld [vmem:[%s4294_s5 + $0xad8] sm:$0xff] }
 0x253   :  { %1135 = vmatprep.subr.mxu1 %v2207_v44  ;;  %1311 = vmatprep.subr.mxu0 %v2299_v45  ;;  %v2306_v44 = vld [vmem:[%s4294_s5 + $0xac0] sm:$0xff]  ;;  %v2308_v45 = vld [vmem:[%s4294_s5 + $0xad0] sm:$0xff] }
 0x254   :  { %1136 = vmatpush1.msra.mxu1 %v2206_v46  ;;  %1312 = vmatpush1.msra.mxu0 %v2298_v47  ;;  %v2301_v46 = vld [vmem:[%s4294_s5 + $0xa98] sm:$0xff]  ;;  %v2303_v47 = vld [vmem:[%s4294_s5 + $0xaa8] sm:$0xff] }
 0x255   :  { %1137 = vmatprep.subr.mxu1 %v2201_v48  ;;  %1313 = vmatprep.subr.mxu0 %v2293_v49  ;;  %v2300_v48 = vld [vmem:[%s4294_s5 + $0xa90] sm:$0xff]  ;;  %v2302_v49 = vld [vmem:[%s4294_s5 + $0xaa0] sm:$0xff] }
 0x256   :  { %1138 = vmatpush1.msra.mxu1 %v2200_v50  ;;  %1314 = vmatpush1.msra.mxu0 %v2292_v51  ;;  %v2295_v50 = vld [vmem:[%s4294_s5 + $0xa68] sm:$0xff]  ;;  %v2297_v51 = vld [vmem:[%s4294_s5 + $0xa78] sm:$0xff] }
 0x257   :  { %1139 = vmatprep.subr.mxu1 %v2195_v52  ;;  %1315 = vmatprep.subr.mxu0 %v2287_v53  ;;  %v2294_v52 = vld [vmem:[%s4294_s5 + $0xa60] sm:$0xff]  ;;  %v2296_v53 = vld [vmem:[%s4294_s5 + $0xa70] sm:$0xff] }
 0x258   :  { %1140 = vmatpush1.msra.mxu1 %v2194_v54  ;;  %1316 = vmatpush1.msra.mxu0 %v2286_v55  ;;  %v2289_v54 = vld [vmem:[%s4294_s5 + $0xa38] sm:$0xff]  ;;  %v2291_v55 = vld [vmem:[%s4294_s5 + $0xa48] sm:$0xff] }
 0x259   :  { %1141 = vmatprep.subr.mxu1 %v2189_v56  ;;  %1317 = vmatprep.subr.mxu0 %v2281_v57  ;;  %v2288_v56 = vld [vmem:[%s4294_s5 + $0xa30] sm:$0xff]  ;;  %v2290_v57 = vld [vmem:[%s4294_s5 + $0xa40] sm:$0xff] }
 0x25a   :  { %1142 = vmatpush1.msra.mxu1 %v2188_v58  ;;  %1318 = vmatpush1.msra.mxu0 %v2280_v59  ;;  %v2283_v58 = vld [vmem:[%s4294_s5 + $0xa08] sm:$0xff]  ;;  %v2285_v59 = vld [vmem:[%s4294_s5 + $0xa18] sm:$0xff] }
 0x25b   :  { %1143 = vmatprep.subr.mxu1 %v2183_v60  ;;  %1319 = vmatprep.subr.mxu0 %v2275_v61  ;;  %v2282_v60 = vld [vmem:[%s4294_s5 + $0xa00] sm:$0xff]  ;;  %v2284_v61 = vld [vmem:[%s4294_s5 + $0xa10] sm:$0xff] }
 0x25c   :  { %1144 = vmatpush1.msra.mxu1 %v2182_v62  ;;  %1320 = vmatpush1.msra.mxu0 %v2274_v63  ;;  %v2277_v62 = vld [vmem:[%s4294_s5 + $0x9d8] sm:$0xff]  ;;  %v2279_v63 = vld [vmem:[%s4294_s5 + $0x9e8] sm:$0xff] }
 0x25d   :  { %1145 = vmatprep.subr.mxu1 %v2177_v0  ;;  %1321 = vmatprep.subr.mxu0 %v2269_v1  ;;  %v2276_v0 = vld [vmem:[%s4294_s5 + $0x9d0] sm:$0xff]  ;;  %v2278_v1 = vld [vmem:[%s4294_s5 + $0x9e0] sm:$0xff] }
 0x25e   :  { %1146 = vmatpush1.msra.mxu1 %v2176_v2  ;;  %1322 = vmatpush1.msra.mxu0 %v2268_v4  ;;  %v2271_v2 = vld [vmem:[%s4294_s5 + $0x9a8] sm:$0xff]  ;;  %v2273_v4 = vld [vmem:[%s4294_s5 + $0x9b8] sm:$0xff] }
 0x25f   :  { %1147 = vmatprep.subr.mxu1 %v2171_v5  ;;  %1323 = vmatprep.subr.mxu0 %v2263_v6  ;;  %v2270_v5 = vld [vmem:[%s4294_s5 + $0x9a0] sm:$0xff]  ;;  %v2272_v6 = vld [vmem:[%s4294_s5 + $0x9b0] sm:$0xff] }
 0x260   :  { %1148 = vmatpush1.msra.mxu1 %v2170_v7  ;;  %1324 = vmatpush1.msra.mxu0 %v2262_v8  ;;  %v2265_v7 = vld [vmem:[%s4294_s5 + $0x978] sm:$0xff]  ;;  %v2267_v8 = vld [vmem:[%s4294_s5 + $0x988] sm:$0xff] }
 0x261   :  { %1149 = vmatprep.subr.mxu1 %v2165_v11  ;;  %1325 = vmatprep.subr.mxu0 %v2257_v12  ;;  %v2264_v11 = vld [vmem:[%s4294_s5 + $0x970] sm:$0xff]  ;;  %v2266_v12 = vld [vmem:[%s4294_s5 + $0x980] sm:$0xff] }
 0x262   :  { %1150 = vmatpush1.msra.mxu1 %v2164_v13  ;;  %1326 = vmatpush1.msra.mxu0 %v2256_v14  ;;  %v2259_v13 = vld [vmem:[%s4294_s5 + $0x948] sm:$0xff]  ;;  %v2261_v14 = vld [vmem:[%s4294_s5 + $0x958] sm:$0xff] }
 0x263   :  { %1151 = vmatprep.subr.mxu1 %v2159_v15  ;;  %1327 = vmatprep.subr.mxu0 %v2251_v17  ;;  %v2258_v15 = vld [vmem:[%s4294_s5 + $0x940] sm:$0xff]  ;;  %v2260_v17 = vld [vmem:[%s4294_s5 + $0x950] sm:$0xff] }
 0x264   :  { %1152 = vmatpush1.msra.mxu1 %v2158_v18  ;;  %1185 = vmatprep.mubr.f32.mxu1 %v2571_v3  ;;  %v2253_v18 = vld [vmem:[%s4294_s5 + $0x918] sm:$0xff] }
 0x265   :  { %1328 = vmatpush1.msra.mxu0 %v2250_v10  ;;  %1361 = vmatprep.mubr.f32.mxu0 %v2571_v3  ;;  %v2255_v10 = vld [vmem:[%s4294_s5 + $0x928] sm:$0xff] }
 0x266   :  { %1186 = vmatmul.mubr.f32.vlgmr.msra.gmra.mxu1 %v3523_v16  ;;  %1362 = vmatmul.mubr.f32.vlgmr.msra.gmra.mxu0 %v3722_v19  ;;  %v2338_v16 = vld [vmem:[%s4294_s5 + $0xbc0] sm:$0xff] }
 0x267   :  { %1368 = vmatprep.subr.mxu1 %v2343_v20  ;;  %1439 = vmatprep.subr.mxu0 %v2345_v21  ;;  %v2252_v20 = vld [vmem:[%s4294_s5 + $0x910] sm:$0xff]  ;;  %v2254_v21 = vld [vmem:[%s4294_s5 + $0x920] sm:$0xff] }
 0x268   :  { %1369 = vmatpush1.msra.mxu1 %v2342_v22  ;;  %1440 = vmatpush1.msra.mxu0 %v2344_v9  ;;  %v1757_v22 = vld [vmem:[%s4297_s8 + $0xf8] sm:$0xff] }
 0x269   :  { %1370 = vmatprep.subr.mxu1 %v2337_v23  ;;  %1441 = vmatprep.subr.mxu0 %v2339_v24  ;;  %v1741_v9 = vld [vmem:[%s4297_s8 + $0x78] sm:$0xff]  ;;  %v1756_v23 = vld [vmem:[%s4297_s8 + $0xf0] sm:$0xff]  ;;  %v1739_v24 = vld [vmem:[%s4297_s8 + $0x68] sm:$0xff] }
 0x26a   :  { %1371 = vmatpush1.msra.mxu1 %v2336_v25  ;;  %1442 = vmatpush1.msra.mxu0 %v2338_v16  ;;  %v1754_v25 = vld [vmem:[%s4297_s8 + $0xe0] sm:$0xff] }
 0x26b   :  { %1372 = vmatprep.subr.mxu1 %v2331_v26  ;;  %1443 = vmatprep.subr.mxu0 %v2333_v27  ;;  %v1738_v16 = vld [vmem:[%s4297_s8 + $0x60] sm:$0xff]  ;;  %v1753_v26 = vld [vmem:[%s4297_s8 + $0xd8] sm:$0xff] }
 0x26c   :  { %1373 = vmatpush1.msra.mxu1 %v2330_v28  ;;  %1444 = vmatpush1.msra.mxu0 %v2332_v29  ;;  %v1737_v27 = vld [vmem:[%s4297_s8 + $0x58] sm:$0xff]  ;;  %v1752_v28 = vld [vmem:[%s4297_s8 + $0xd0] sm:$0xff] }
 0x26d   :  { %1374 = vmatprep.subr.mxu1 %v2325_v30  ;;  %1445 = vmatprep.subr.mxu0 %v2327_v31  ;;  %v1736_v29 = vld [vmem:[%s4297_s8 + $0x50] sm:$0xff]  ;;  %v1751_v30 = vld [vmem:[%s4297_s8 + $0xc8] sm:$0xff] }
 0x26e   :  { %1375 = vmatpush1.msra.mxu1 %v2324_v32  ;;  %1446 = vmatpush1.msra.mxu0 %v2326_v33  ;;  %v1735_v31 = vld [vmem:[%s4297_s8 + $0x48] sm:$0xff]  ;;  %v1750_v32 = vld [vmem:[%s4297_s8 + $0xc0] sm:$0xff] }
 0x26f   :  { %1376 = vmatprep.subr.mxu1 %v2319_v34  ;;  %1447 = vmatprep.subr.mxu0 %v2321_v35  ;;  %v1734_v33 = vld [vmem:[%s4297_s8 + $0x40] sm:$0xff]  ;;  %v1749_v34 = vld [vmem:[%s4297_s8 + $0xb8] sm:$0xff] }
 0x270   :  { %1377 = vmatpush1.msra.mxu1 %v2318_v36  ;;  %1448 = vmatpush1.msra.mxu0 %v2320_v37  ;;  %v1733_v35 = vld [vmem:[%s4297_s8 + $0x38] sm:$0xff]  ;;  %v1748_v36 = vld [vmem:[%s4297_s8 + $0xb0] sm:$0xff] }
 0x271   :  { %1378 = vmatprep.subr.mxu1 %v2313_v38  ;;  %1449 = vmatprep.subr.mxu0 %v2315_v39  ;;  %v1732_v37 = vld [vmem:[%s4297_s8 + $0x30] sm:$0xff]  ;;  %v1747_v38 = vld [vmem:[%s4297_s8 + $0xa8] sm:$0xff] }
 0x272   :  { %1379 = vmatpush1.msra.mxu1 %v2312_v40  ;;  %1450 = vmatpush1.msra.mxu0 %v2314_v41  ;;  %v1731_v39 = vld [vmem:[%s4297_s8 + $0x28] sm:$0xff]  ;;  %v1746_v40 = vld [vmem:[%s4297_s8 + $0xa0] sm:$0xff] }
 0x273   :  { %1380 = vmatprep.subr.mxu1 %v2307_v42  ;;  %1451 = vmatprep.subr.mxu0 %v2309_v43  ;;  %v1730_v41 = vld [vmem:[%s4297_s8 + $0x20] sm:$0xff]  ;;  %v1745_v42 = vld [vmem:[%s4297_s8 + $0x98] sm:$0xff] }
 0x274   :  { %1381 = vmatpush1.msra.mxu1 %v2306_v44  ;;  %1452 = vmatpush1.msra.mxu0 %v2308_v45  ;;  %v1729_v43 = vld [vmem:[%s4297_s8 + $0x18] sm:$0xff]  ;;  %v1744_v44 = vld [vmem:[%s4297_s8 + $0x90] sm:$0xff] }
 0x275   :  { %1382 = vmatprep.subr.mxu1 %v2301_v46  ;;  %1453 = vmatprep.subr.mxu0 %v2303_v47  ;;  %v1728_v45 = vld [vmem:[%s4297_s8 + $0x10] sm:$0xff]  ;;  %v1743_v46 = vld [vmem:[%s4297_s8 + $0x88] sm:$0xff] }
 0x276   :  { %1383 = vmatpush1.msra.mxu1 %v2300_v48  ;;  %1454 = vmatpush1.msra.mxu0 %v2302_v49  ;;  %v1727_v47 = vld [vmem:[%s4297_s8 + $0x8] sm:$0xff]  ;;  %v1742_v48 = vld [vmem:[%s4297_s8 + $0x80] sm:$0xff] }
 0x277   :  { %1384 = vmatprep.subr.mxu1 %v2295_v50  ;;  %1455 = vmatprep.subr.mxu0 %v2297_v51  ;;  %v1726_v49 = vld [vmem:[%s4297_s8] sm:$0xff]  ;;  %v1789_v50 = vld [vmem:[%s4297_s8 + $0x1f8] sm:$0xff] }
 0x278   :  { %1385 = vmatpush1.msra.mxu1 %v2294_v52  ;;  %1456 = vmatpush1.msra.mxu0 %v2296_v53  ;;  %v1821_v51 = vld [vmem:[%s4297_s8 + $0x2f8] sm:$0xff]  ;;  %v1788_v53 = vld [vmem:[%s4297_s8 + $0x1f0] sm:$0xff] }
 0x279   :  { %1386 = vmatprep.subr.mxu1 %v2289_v54  ;;  %1457 = vmatprep.subr.mxu0 %v2291_v55  ;;  %v1773_v52 = vld [vmem:[%s4297_s8 + $0x178] sm:$0xff]  ;;  %v1772_v54 = vld [vmem:[%s4297_s8 + $0x170] sm:$0xff]  ;;  %v1787_v55 = vld [vmem:[%s4297_s8 + $0x1e8] sm:$0xff] }
 0x27a   :  { %1387 = vmatpush1.msra.mxu1 %v2288_v56  ;;  %1458 = vmatpush1.msra.mxu0 %v2290_v57  ;;  %v1771_v56 = vld [vmem:[%s4297_s8 + $0x168] sm:$0xff]  ;;  %v1786_v57 = vld [vmem:[%s4297_s8 + $0x1e0] sm:$0xff] }
 0x27b   :  { %1388 = vmatprep.subr.mxu1 %v2283_v58  ;;  %1459 = vmatprep.subr.mxu0 %v2285_v59  ;;  %v1770_v58 = vld [vmem:[%s4297_s8 + $0x160] sm:$0xff]  ;;  %v1785_v59 = vld [vmem:[%s4297_s8 + $0x1d8] sm:$0xff] }
 0x27c   :  { %1389 = vmatpush1.msra.mxu1 %v2282_v60  ;;  %1460 = vmatpush1.msra.mxu0 %v2284_v61  ;;  %v1769_v60 = vld [vmem:[%s4297_s8 + $0x158] sm:$0xff]  ;;  %v1784_v61 = vld [vmem:[%s4297_s8 + $0x1d0] sm:$0xff] }
 0x27d   :  { %1390 = vmatprep.subr.mxu1 %v2277_v62  ;;  %1461 = vmatprep.subr.mxu0 %v2279_v63  ;;  %v1768_v62 = vld [vmem:[%s4297_s8 + $0x150] sm:$0xff]  ;;  %v1783_v63 = vld [vmem:[%s4297_s8 + $0x1c8] sm:$0xff] }
 0x27e   :  { %1391 = vmatpush1.msra.mxu1 %v2276_v0  ;;  %1462 = vmatpush1.msra.mxu0 %v2278_v1  ;;  %v1767_v0 = vld [vmem:[%s4297_s8 + $0x148] sm:$0xff]  ;;  %v1782_v1 = vld [vmem:[%s4297_s8 + $0x1c0] sm:$0xff] }
 0x27f   :  { %1392 = vmatprep.subr.mxu1 %v2271_v2  ;;  %1463 = vmatprep.subr.mxu0 %v2273_v4  ;;  %v1766_v2 = vld [vmem:[%s4297_s8 + $0x140] sm:$0xff]  ;;  %v1781_v4 = vld [vmem:[%s4297_s8 + $0x1b8] sm:$0xff] }
 0x280   :  { %1393 = vmatpush1.msra.mxu1 %v2270_v5  ;;  %1464 = vmatpush1.msra.mxu0 %v2272_v6  ;;  %v1765_v5 = vld [vmem:[%s4297_s8 + $0x138] sm:$0xff]  ;;  %v1780_v6 = vld [vmem:[%s4297_s8 + $0x1b0] sm:$0xff] }
 0x281   :  { %1394 = vmatprep.subr.mxu1 %v2265_v7  ;;  %1465 = vmatprep.subr.mxu0 %v2267_v8  ;;  %v1764_v7 = vld [vmem:[%s4297_s8 + $0x130] sm:$0xff]  ;;  %v1779_v8 = vld [vmem:[%s4297_s8 + $0x1a8] sm:$0xff] }
 0x282   :  { %1395 = vmatpush1.msra.mxu1 %v2264_v11  ;;  %1466 = vmatpush1.msra.mxu0 %v2266_v12  ;;  %v1763_v11 = vld [vmem:[%s4297_s8 + $0x128] sm:$0xff]  ;;  %v1778_v12 = vld [vmem:[%s4297_s8 + $0x1a0] sm:$0xff] }
 0x283   :  { %1396 = vmatprep.subr.mxu1 %v2259_v13  ;;  %1467 = vmatprep.subr.mxu0 %v2261_v14  ;;  %v1762_v13 = vld [vmem:[%s4297_s8 + $0x120] sm:$0xff]  ;;  %v1777_v14 = vld [vmem:[%s4297_s8 + $0x198] sm:$0xff] }
 0x284   :  { %1397 = vmatpush1.msra.mxu1 %v2258_v15  ;;  %1468 = vmatpush1.msra.mxu0 %v2260_v17  ;;  %v1761_v15 = vld [vmem:[%s4297_s8 + $0x118] sm:$0xff]  ;;  %v1776_v17 = vld [vmem:[%s4297_s8 + $0x190] sm:$0xff] }
 0x285   :  { %1398 = vmatprep.subr.mxu1 %v2253_v18  ;;  %1469 = vmatprep.subr.mxu0 %v2255_v10  ;;  %v1760_v18 = vld [vmem:[%s4297_s8 + $0x110] sm:$0xff]  ;;  %v1775_v10 = vld [vmem:[%s4297_s8 + $0x188] sm:$0xff] }
 0x286   :  { %1399 = vmatpush1.msra.mxu1 %v2252_v20  ;;  %1432 = vmatprep.mubr.f32.mxu1 %v2571_v3  ;;  %v1759_v20 = vld [vmem:[%s4297_s8 + $0x108] sm:$0xff] }
 0x287   :  { %1470 = vmatpush1.msra.mxu0 %v2254_v21  ;;  %1503 = vmatprep.mubr.f32.mxu0 %v2571_v3  ;;  %v1740_v3 = vld [vmem:[%s4297_s8 + $0x70] sm:$0xff]  ;;  %v1774_v21 = vld [vmem:[%s4297_s8 + $0x180] sm:$0xff] }
 0x288   :  { %1433 = vmatmul.mubr.f32.vlgmr.msra.gmra.mxu1 %v3722_v19  ;;  %1504 = vmatmul.mubr.f32.vlgmr.msra.gmra.mxu0 %v3722_v19  ;;  %v1755_v19 = vld [vmem:[%s4297_s8 + $0xe8] sm:$0xff] }
 0x289   :  { %2373 = vmatprep.subr.mxu1 %v1757_v22  ;;  %2408 = vmatprep.subr.mxu0 %v1789_v50  ;;  %v1758_v22 = vld [vmem:[%s4297_s8 + $0x100] sm:$0xff] }
 0x28a   :  { %2374 = vmatpush3.msra.mxu1 %v1741_v9  ;;  %2409 = vmatpush3.msra.mxu0 %v1773_v52 }
 0x28b   :  { %2375 = vmatprep.subr.mxu1 %v1756_v23  ;;  %2410 = vmatprep.subr.mxu0 %v1788_v53 }
 0x28c   :  { %2376 = vmatpush3.msra.mxu1 %v1740_v3  ;;  %2411 = vmatpush3.msra.mxu0 %v1772_v54 }
 0x28d   :  { %2377 = vmatprep.subr.mxu1 %v1755_v19  ;;  %2412 = vmatprep.subr.mxu0 %v1787_v55 }
 0x28e   :  { %2378 = vmatpush3.msra.mxu1 %v1739_v24  ;;  %2413 = vmatpush3.msra.mxu0 %v1771_v56 }
 0x28f   :  { %2379 = vmatprep.subr.mxu1 %v1754_v25  ;;  %2414 = vmatprep.subr.mxu0 %v1786_v57 }
 0x290   :  { %2380 = vmatpush3.msra.mxu1 %v1738_v16  ;;  %2415 = vmatpush3.msra.mxu0 %v1770_v58 }
 0x291   :  { %2381 = vmatprep.subr.mxu1 %v1753_v26  ;;  %2416 = vmatprep.subr.mxu0 %v1785_v59 }
 0x292   :  { %2382 = vmatpush3.msra.mxu1 %v1737_v27  ;;  %2417 = vmatpush3.msra.mxu0 %v1769_v60 }
 0x293   :  { %2383 = vmatprep.subr.mxu1 %v1752_v28  ;;  %2418 = vmatprep.subr.mxu0 %v1784_v61 }
 0x294   :  { %2384 = vmatpush3.msra.mxu1 %v1736_v29  ;;  %2419 = vmatpush3.msra.mxu0 %v1768_v62 }
 0x295   :  { %2385 = vmatprep.subr.mxu1 %v1751_v30  ;;  %2420 = vmatprep.subr.mxu0 %v1783_v63 }
 0x296   :  { %2386 = vmatpush3.msra.mxu1 %v1735_v31  ;;  %2421 = vmatpush3.msra.mxu0 %v1767_v0 }
 0x297   :  { %2387 = vmatprep.subr.mxu1 %v1750_v32  ;;  %2422 = vmatprep.subr.mxu0 %v1782_v1 }
 0x298   :  { %2388 = vmatpush3.msra.mxu1 %v1734_v33  ;;  %2423 = vmatpush3.msra.mxu0 %v1766_v2 }
 0x299   :  { %2389 = vmatprep.subr.mxu1 %v1749_v34  ;;  %2424 = vmatprep.subr.mxu0 %v1781_v4 }
 0x29a   :  { %2390 = vmatpush3.msra.mxu1 %v1733_v35  ;;  %2425 = vmatpush3.msra.mxu0 %v1765_v5 }
 0x29b   :  { %2391 = vmatprep.subr.mxu1 %v1748_v36  ;;  %2426 = vmatprep.subr.mxu0 %v1780_v6 }
 0x29c   :  { %2392 = vmatpush3.msra.mxu1 %v1732_v37  ;;  %2427 = vmatpush3.msra.mxu0 %v1764_v7 }
 0x29d   :  { %2393 = vmatprep.subr.mxu1 %v1747_v38  ;;  %2428 = vmatprep.subr.mxu0 %v1779_v8 }
 0x29e   :  { %2394 = vmatpush3.msra.mxu1 %v1731_v39  ;;  %2429 = vmatpush3.msra.mxu0 %v1763_v11 }
 0x29f   :  { %2395 = vmatprep.subr.mxu1 %v1746_v40  ;;  %2430 = vmatprep.subr.mxu0 %v1778_v12  ;;  %v520_v9 = vpop.f32.mrf.mxu1  ;;  %v591_v23 = vpop.f32.mrf.mxu0 }
 0x2a0   :  { %2396 = vmatpush3.msra.mxu1 %v1730_v41  ;;  %2431 = vmatpush3.msra.mxu0 %v1762_v13 }
 0x2a1   :  { %2397 = vmatprep.subr.mxu1 %v1745_v42  ;;  %2432 = vmatprep.subr.mxu0 %v1777_v14  ;;  %v522_v3 = vpop.f32.mrf.mxu1  ;;  %v593_v19 = vpop.f32.mrf.mxu0 }
 0x2a2   :  { %2398 = vmatpush3.msra.mxu1 %v1729_v43  ;;  %2433 = vmatpush3.msra.mxu0 %v1761_v15 }
 0x2a3   :  { %2399 = vmatprep.subr.mxu1 %v1744_v44  ;;  %2434 = vmatprep.subr.mxu0 %v1776_v17 }
 0x2a4   :  { %2400 = vmatpush3.msra.mxu1 %v1728_v45  ;;  %2435 = vmatpush3.msra.mxu0 %v1760_v18 }
 0x2a5   :  { %2401 = vmatprep.subr.mxu1 %v1743_v46  ;;  %2436 = vmatprep.subr.mxu0 %v1775_v10 }
 0x2a6   :  { %2402 = vmatpush3.msra.mxu1 %v1727_v47  ;;  %2437 = vmatpush3.msra.mxu0 %v1759_v20 }
 0x2a7   :  { %2403 = vmatprep.subr.mxu1 %v1742_v48  ;;  %2438 = vmatprep.subr.mxu0 %v1774_v21 }
 0x2a8   :  { %2404 = vmatpush3.msra.mxu1 %v1726_v49  ;;  %2439 = vmatpush3.msra.mxu0 %v1758_v22 }
 0x2a9   :  { %2443 = vmatprep.subr.mxu1 %v1821_v51 }
 0x2c0   :  { %v662_v24 = vpop.f32.mrf.mxu1  ;;  %v733_v25 = vpop.f32.mrf.mxu0 }
 0x2c1   :  { %v734_v33 = vadd.f32 %v733_v25, %v520_v9 }
 0x2c2   :  { %v664_v16 = vpop.f32.mrf.mxu1  ;;  %v735_v26 = vpop.f32.mrf.mxu0 }
 0x2c3   :  { %v736_v36 = vadd.f32 %v735_v26, %v522_v3 }
 0x2e2   :  { %v804_v27 = vpop.f32.mrf.mxu1  ;;  %v875_v28 = vpop.f32.mrf.mxu0 }
 0x2e3   :  { %v805_v12 = vadd.f32 %v804_v27, %v591_v23  ;;  %v876_v13 = vadd.f32 %v875_v28, %v662_v24 }
 0x2e4   :  { %v806_v29 = vpop.f32.mrf.mxu1  ;;  %v877_v30 = vpop.f32.mrf.mxu0 }
 0x2e5   :  { %v807_v22 = vadd.f32 %v806_v29, %v593_v19  ;;  %v878_v9 = vadd.f32 %v877_v30, %v664_v16  ;;  %v1646_v29 = vlaneseq }
 0x304   :  { %v1045_v31 = vpop.f32.mrf.mxu1  ;;  %v1116_v32 = vpop.f32.mrf.mxu0 }
 0x305   :  { %v1192_v37 = vadd.f32 %v1045_v31, %v734_v33  ;;  %v1194_v18 = vadd.f32 %v1116_v32, %v805_v12  ;;  %v4147_v12 = vld [vmem:[%s4296_s7] sm:$0x3f] }
 0x306   :  { %v1047_v34 = vpop.f32.mrf.mxu1  ;;  %v1118_v35 = vpop.f32.mrf.mxu0 }
 0x307   :  { %v1193_v39 = vadd.f32 %v1047_v34, %v736_v36  ;;  %v1195_v36 = vadd.f32 %v1118_v35, %v807_v22 }
 0x326   :  { %v1363_v38 = vpop.f32.mrf.mxu0  ;;  %v1187_v7 = vpop.f32.mrf.mxu1 }
 0x327   :  { %v1510_v40 = vadd.f32 %v1363_v38, %v1192_v37  ;;  %v1196_v10 = vadd.f32 %v1187_v7, %v876_v13 }
 0x328   :  { %v1365_v41 = vpop.f32.mrf.mxu0  ;;  %v1189_v17 = vpop.f32.mrf.mxu1 }
 0x329   :  { %v1517_v42 = vsel %vm1516_vm2, %v1510_v40, 0.0  ;;  %v1511_v43 = vadd.f32 %v1365_v41, %v1193_v39  ;;  %v1197_v37 = vadd.f32 %v1189_v17, %v878_v9 }
 0x32a   :  { %v1518_v44 = vrot.slane %v1517_v42, 4 }
 0x32b   :  { %v1524_v45 = vsel %vm1516_vm2, %v1511_v43, 0.0 }
 0x32c   :  { %v1519_v46 = vadd.f32 %v1518_v44, %v1517_v42  ;;  %v1525_v47 = vrot.slane %v1524_v45, 4 }
 0x32e   :  { %v1520_v48 = vrot.slane %v1519_v46, 2  ;;  %v1526_v49 = vadd.f32 %v1525_v47, %v1524_v45 }
 0x330   :  { %v1521_v50 = vadd.f32 %v1520_v48, %v1519_v46  ;;  %v1527_v51 = vrot.slane %v1526_v49, 2  ;;  %v4134_v48 = vshrl.u32 %v1646_v29, 7 }
 0x332   :  { %v1522_v52 = vrot.slane %v1521_v50, 1  ;;  %v1528_v53 = vadd.f32 %v1527_v51, %v1526_v49 }
 0x334   :  { %v1523_v54 = vadd.f32 %v1522_v52, %v1521_v50  ;;  %v1529_v55 = vrot.slane %v1528_v53, 1 }
 0x336   :  { %v1560_v56 = vmul.f32 0.5, %v1523_v54  ;;  %v1530_v57 = vadd.f32 %v1529_v55, %v1528_v53 }
 0x338   :  { %v4120_v58 = vsub.f32 %v1510_v40, %v1560_v56  ;;  %v1561_v59 = vmul.f32 0.5, %v1530_v57  ;;  %v1648_v57 = vsub.s32 0, %v4134_v48 }
 0x33a   :  { %v1572_v60 = vmul.f32 %v4120_v58, %v4120_v58  ;;  %v4124_v61 = vsub.f32 %v1511_v43, %v1561_v59 }
 0x33c   :  { %v1578_v62 = vsel %vm1516_vm2, %v1572_v60, 0.0  ;;  %v1573_v63 = vmul.f32 %v4124_v61, %v4124_v61 }
 0x33d   :  { %v1579_v0 = vrot.slane %v1578_v62, 4 }
 0x33e   :  { %v1585_v1 = vsel %vm1516_vm2, %v1573_v63, 0.0 }
 0x33f   :  { %v1580_v2 = vadd.f32 %v1579_v0, %v1578_v62  ;;  %v1586_v4 = vrot.slane %v1585_v1, 4  ;;  %v4140_v62 = vld [vmem:[%s4295_s6] sm:$0x3f] }
 0x340   :  { %v1649_v7 = vrot.slane %v4140_v62, %v1648_v57 }
 0x341   :  { %v1581_v5 = vrot.slane %v1580_v2, 2  ;;  %v1587_v6 = vadd.f32 %v1586_v4, %v1585_v1 }
 0x343   :  { %v1582_v8 = vadd.f32 %v1581_v5, %v1580_v2  ;;  %v1588_v11 = vrot.slane %v1587_v6, 2 }
 0x345   :  { %v1583_v14 = vrot.slane %v1582_v8, 1  ;;  %v1589_v15 = vadd.f32 %v1588_v11, %v1587_v6  ;;  %v1652_v6 = vsub.s32 1, %v4134_v48 }
 0x347   :  { %v1584_v20 = vadd.f32 %v1583_v14, %v1582_v8  ;;  %v1590_v21 = vrot.slane %v1589_v15, 1  ;;  %v1653_v9 = vrot.slane %v4140_v62, %v1652_v6 }
 0x348   :  { %v1434_v3 = vpop.f32.mrf.mxu1  ;;  %v1505_v25 = vpop.f32.mrf.mxu0 }
 0x349   :  { %v1620_v26 = vmul.f32 0.5, %v1584_v20  ;;  %v1591_v31 = vadd.f32 %v1590_v21, %v1589_v15  ;;  %v1512_v33 = vadd.f32 %v1434_v3, %v1194_v18  ;;  %v1514_v34 = vadd.f32 %v1505_v25, %v1196_v10 }
 0x34a   :  { %v1436_v38 = vpop.f32.mrf.mxu1  ;;  %v1507_v23 = vpop.f32.mrf.mxu0  ;;  %v1687_v3 = vrot.slane %v4147_v12, %v1648_v57  ;;  %v1819_v57 = vld [vmem:[%s4297_s8 + $0x2e8] sm:$0xff] }
 0x34b   :  { %v1626_v24 = vadd.f32 1e-05, %v1620_v26  ;;  %v1621_v27 = vmul.f32 0.5, %v1591_v31  ;;  %v1531_v28 = vsel %vm1516_vm2, %v1512_v33, 0.0  ;;  %v1545_v32 = vsel %vm1516_vm2, %v1514_v34, 0.0 }
 0x34c   :  { %v1532_v39 = vrot.slane %v1531_v28, 4  ;;  %v1546_v40 = vrot.slane %v1545_v32, 4  ;;  %v1513_v19 = vadd.f32 %v1436_v38, %v1195_v36  ;;  %v1515_v16 = vadd.f32 %v1507_v23, %v1197_v37 }
 0x34d   :  { %2537 = vrsqrt.f32 %v1626_v24  ;;  %v1627_v30 = vadd.f32 1e-05, %v1621_v27  ;;  %v1691_v36 = vrot.slane %v4147_v12, %v1652_v6  ;;  %v1802_v6 = vld [vmem:[%s4297_s8 + $0x260] sm:$0xff] }
 0x34e   :  { %v1533_v41 = vadd.f32 %v1532_v39, %v1531_v28  ;;  %v1547_v42 = vadd.f32 %v1546_v40, %v1545_v32  ;;  %v1538_v35 = vsel %vm1516_vm2, %v1513_v19, 0.0  ;;  %v1552_v43 = vsel %vm1516_vm2, %v1515_v16, 0.0 }
 0x34f   :  { %2539 = vrsqrt.f32 %v1627_v30  ;;  %v1539_v44 = vrot.slane %v1538_v35, 4  ;;  %v1553_v45 = vrot.slane %v1552_v43, 4 }
 0x350   :  { %v1534_v46 = vrot.slane %v1533_v41, 2  ;;  %v1548_v47 = vrot.slane %v1547_v42, 2 }
 0x351   :  { %v1540_v49 = vadd.f32 %v1539_v44, %v1538_v35  ;;  %v1554_v50 = vadd.f32 %v1553_v45, %v1552_v43 }
 0x352   :  { %v1535_v51 = vadd.f32 %v1534_v46, %v1533_v41  ;;  %v1549_v52 = vadd.f32 %v1548_v47, %v1547_v42  ;;  %v1805_v47 = vld [vmem:[%s4297_s8 + $0x278] sm:$0xff] }
 0x353   :  { %v1541_v53 = vrot.slane %v1540_v49, 2  ;;  %v1555_v54 = vrot.slane %v1554_v50, 2 }
 0x354   :  { %v1536_v55 = vrot.slane %v1535_v51, 1  ;;  %v1550_v56 = vrot.slane %v1549_v52, 1 }
 0x355   :  { %v1542_v59 = vadd.f32 %v1541_v53, %v1540_v49  ;;  %v1556_v60 = vadd.f32 %v1555_v54, %v1554_v50  ;;  %v1804_v54 = vld [vmem:[%s4297_s8 + $0x270] sm:$0xff] }
 0x356   :  { %v1537_v63 = vadd.f32 %v1536_v55, %v1535_v51  ;;  %v1551_v0 = vadd.f32 %v1550_v56, %v1549_v52  ;;  %v1820_v51 = vld [vmem:[%s4297_s8 + $0x2f0] sm:$0xff] }
 0x357   :  { %v1543_v1 = vrot.slane %v1542_v59, 1  ;;  %v1557_v2 = vrot.slane %v1556_v60, 1 }
 0x358   :  { %v1562_v4 = vmul.f32 0.5, %v1537_v63  ;;  %v1564_v5 = vmul.f32 0.5, %v1551_v0  ;;  %v1803_v63 = vld [vmem:[%s4297_s8 + $0x268] sm:$0xff] }
 0x359   :  { %v1544_v8 = vadd.f32 %v1543_v1, %v1542_v59  ;;  %v1558_v11 = vadd.f32 %v1557_v2, %v1556_v60  ;;  %v1818_v2 = vld [vmem:[%s4297_s8 + $0x2e0] sm:$0xff] }
 0x35a   :  { %v2538_v13 = vpop.eup %2537  ;;  %v4149_v14 = vsub.f32 %v1512_v33, %v1562_v4  ;;  %v4151_v15 = vsub.f32 %v1514_v34, %v1564_v5 }
 0x35b   :  { %v1638_v17 = vmul.f32 %v2538_v13, %v4120_v58  ;;  %v1563_v18 = vmul.f32 0.5, %v1544_v8  ;;  %v1565_v10 = vmul.f32 0.5, %v1558_v11  ;;  %v1817_v11 = vld [vmem:[%s4297_s8 + $0x2d8] sm:$0xff] }
 0x35c   :  { %v2540_v20 = vpop.eup %2539  ;;  %v1574_v21 = vmul.f32 %v4149_v14, %v4149_v14  ;;  %v1576_v22 = vmul.f32 %v4151_v15, %v4151_v15 }
 0x35d   :  { %v1676_v25 = vmul.f32 %v1649_v7, %v1638_v17  ;;  %v1639_v26 = vmul.f32 %v2540_v20, %v4124_v61  ;;  %v4161_v31 = vsub.f32 %v1513_v19, %v1563_v18  ;;  %v4163_v33 = vsub.f32 %v1515_v16, %v1565_v10  ;;  %v1801_v18 = vld [vmem:[%s4297_s8 + $0x258] sm:$0xff] }
 0x35e   :  { %v1592_v58 = vsel %vm1516_vm2, %v1574_v21, 0.0  ;;  %v1606_v34 = vsel %vm1516_vm2, %v1576_v22, 0.0  ;;  %v1816_v21 = vld [vmem:[%s4297_s8 + $0x2d0] sm:$0xff] }
 0x35f   :  { %v1593_v37 = vrot.slane %v1592_v58, 4  ;;  %v1607_v38 = vrot.slane %v1606_v34, 4  ;;  %v1575_v23 = vmul.f32 %v4161_v31, %v4161_v31  ;;  %v1577_v24 = vmul.f32 %v4163_v33, %v4163_v33  ;;  %v1800_v22 = vld [vmem:[%s4297_s8 + $0x250] sm:$0xff] }
 0x360   :  { %v1677_v27 = vmul.f32 %v1653_v9, %v1639_v26  ;;  %v1714_v61 = vadd.f32 %v1687_v3, %v1676_v25  ;;  %v1815_v25 = vld [vmem:[%s4297_s8 + $0x2c8] sm:$0xff] }
 0x361   :  { %v1594_v28 = vadd.f32 %v1593_v37, %v1592_v58  ;;  %v1608_v32 = vadd.f32 %v1607_v38, %v1606_v34  ;;  %v1599_v39 = vsel %vm1516_vm2, %v1575_v23, 0.0  ;;  %v1613_v40 = vsel %vm1516_vm2, %v1577_v24, 0.0  ;;  %v1799_v26 = vld [vmem:[%s4297_s8 + $0x248] sm:$0xff]  ;;  %v1814_v58 = vld [vmem:[%s4297_s8 + $0x2c0] sm:$0xff]  ;;  %v1797_v37 = vld [vmem:[%s4297_s8 + $0x238] sm:$0xff] }
 0x362   :  { %v1600_v19 = vrot.slane %v1599_v39, 4  ;;  %v1614_v16 = vrot.slane %v1613_v40, 4  ;;  %v1715_v29 = vadd.f32 %v1691_v36, %v1677_v27  ;;  %v1720_v46 = vmax.f32 %v1714_v61, 0.0  ;;  %v1798_v34 = vld [vmem:[%s4297_s8 + $0x240] sm:$0xff]  ;;  %v1813_v36 = vld [vmem:[%s4297_s8 + $0x2b8] sm:$0xff]  ;;  %v1812_v38 = vld [vmem:[%s4297_s8 + $0x2b0] sm:$0xff] }
 0x363   :  { %v1595_v30 = vrot.slane %v1594_v28, 2  ;;  %v1609_v41 = vrot.slane %v1608_v32, 2  ;;  %v1656_v23 = vsub.s32 2, %v4134_v48  ;;  %v1796_v24 = vld [vmem:[%s4297_s8 + $0x230] sm:$0xff]  ;;  %v1664_v27 = vsub.s32 4, %v4134_v48  ;;  %v1811_v61 = vld [vmem:[%s4297_s8 + $0x2a8] sm:$0xff] }
 0x364   :  { %v1601_v42 = vadd.f32 %v1600_v19, %v1599_v39  ;;  %v1615_v35 = vadd.f32 %v1614_v16, %v1613_v40  ;;  %v1721_v43 = vmax.f32 %v1715_v29, 0.0  ;;  %v1660_v39 = vsub.s32 3, %v4134_v48  ;;  %v1794_v19 = vld [vmem:[%s4297_s8 + $0x220] sm:$0xff] }
 0x365   :  { %v1596_v44 = vadd.f32 %v1595_v30, %v1594_v28  ;;  %v1610_v45 = vadd.f32 %v1609_v41, %v1608_v32  ;;  %v1795_v28 = vld [vmem:[%s4297_s8 + $0x228] sm:$0xff]  ;;  %v1810_v32 = vld [vmem:[%s4297_s8 + $0x2a0] sm:$0xff]  ;;  %v1657_v40 = vrot.slane %v4140_v62, %v1656_v23  ;;  %v1668_v16 = vsub.s32 5, %v4134_v48  ;;  %v1809_v41 = vld [vmem:[%s4297_s8 + $0x298] sm:$0xff] }
 0x366   :  { %v1602_v49 = vrot.slane %v1601_v42, 2  ;;  %v1616_v50 = vrot.slane %v1615_v35, 2  ;;  %1893 = vmatprep.mubr.f32.mxu1 %v1721_v43  ;;  %v1665_v30 = vrot.slane %v4140_v62, %v1664_v27  ;;  %v1793_v43 = vld [vmem:[%s4297_s8 + $0x218] sm:$0xff]  ;;  %v1808_v48 = vld [vmem:[%s4297_s8 + $0x290] sm:$0xff] }
 0x367   :  { %v1597_v52 = vrot.slane %v1596_v44, 1  ;;  %v1611_v53 = vrot.slane %v1610_v45, 1  ;;  %1894 = vmatmul.mubr.f32.vlgmr.msra.gmra.mxu1 %v1720_v46 }
 0x368   :  { %v1603_v55 = vadd.f32 %v1602_v49, %v1601_v42  ;;  %v1617_v56 = vadd.f32 %v1616_v50, %v1615_v35  ;;  %2444 = vmatpush3.msra.mxu1 %v1805_v47  ;;  %v1669_v49 = vrot.slane %v4140_v62, %v1668_v16  ;;  %v1695_v50 = vrot.slane %v4147_v12, %v1656_v23 }
 0x369   :  { %v1598_v59 = vadd.f32 %v1597_v52, %v1596_v44  ;;  %v1612_v60 = vadd.f32 %v1611_v53, %v1610_v45  ;;  %2445 = vmatprep.subr.mxu1 %v1820_v51  ;;  %v1661_v45 = vrot.slane %v4140_v62, %v1660_v39  ;;  %v1807_v53 = vld [vmem:[%s4297_s8 + $0x288] sm:$0xff] }
 0x36a   :  { %v1604_v0 = vrot.slane %v1603_v55, 1  ;;  %v1618_v1 = vrot.slane %v1617_v56, 1  ;;  %2446 = vmatpush3.msra.mxu1 %v1804_v54  ;;  %v1699_v54 = vrot.slane %v4147_v12, %v1660_v39  ;;  %v1791_v62 = vld [vmem:[%s4297_s8 + $0x208] sm:$0xff] }
 0x36b   :  { %v1622_v4 = vmul.f32 0.5, %v1598_v59  ;;  %v1624_v5 = vmul.f32 0.5, %v1612_v60  ;;  %2447 = vmatprep.subr.mxu1 %v1819_v57  ;;  %v1707_v57 = vrot.slane %v4147_v12, %v1668_v16  ;;  %v1790_v60 = vld [vmem:[%s4297_s8 + $0x200] sm:$0xff] }
 0x36c   :  { %v1605_v7 = vadd.f32 %v1604_v0, %v1603_v55  ;;  %v1619_v8 = vadd.f32 %v1618_v1, %v1617_v56  ;;  %2448 = vmatpush3.msra.mxu1 %v1803_v63  ;;  %v1703_v55 = vrot.slane %v4147_v12, %v1664_v27 }
 0x36d   :  { %v1628_v13 = vadd.f32 1e-05, %v1622_v4  ;;  %v1630_v17 = vadd.f32 1e-05, %v1624_v5  ;;  %2449 = vmatprep.subr.mxu1 %v1818_v2 }
 0x36e   :  { %v1623_v10 = vmul.f32 0.5, %v1605_v7  ;;  %v1625_v20 = vmul.f32 0.5, %v1619_v8  ;;  %2450 = vmatpush3.msra.mxu1 %v1802_v6 }
 0x36f   :  { %2541 = vrsqrt.f32 %v1628_v13  ;;  %2451 = vmatprep.subr.mxu1 %v1817_v11  ;;  %v2346_v13 = vld [vmem:[%s4298_s9] ss:$0 sm:$0xff] }
 0x370   :  { %2543 = vrsqrt.f32 %v1630_v17  ;;  %v1629_v9 = vadd.f32 1e-05, %v1623_v10  ;;  %v1631_v3 = vadd.f32 1e-05, %v1625_v20  ;;  %2452 = vmatpush3.msra.mxu1 %v1801_v18 }
 0x371   :  { %2453 = vmatprep.subr.mxu1 %v1816_v21 }
 0x372   :  { %2545 = vrsqrt.f32 %v1629_v9  ;;  %2454 = vmatpush3.msra.mxu1 %v1800_v22 }
 0x373   :  { %2547 = vrsqrt.f32 %v1631_v3  ;;  %2455 = vmatprep.subr.mxu1 %v1815_v25 }
 0x374   :  { %2456 = vmatpush3.msra.mxu1 %v1799_v26 }
 0x375   :  { %2457 = vmatprep.subr.mxu1 %v1814_v58 }
 0x376   :  { %2458 = vmatpush3.msra.mxu1 %v1798_v34 }
 0x377   :  { %2459 = vmatprep.subr.mxu1 %v1813_v36 }
 0x378   :  { %2460 = vmatpush3.msra.mxu1 %v1797_v37 }
 0x379   :  { %2461 = vmatprep.subr.mxu1 %v1812_v38 }
 0x37a   :  { %2462 = vmatpush3.msra.mxu1 %v1796_v24 }
 0x37b   :  { %2463 = vmatprep.subr.mxu1 %v1811_v61 }
 0x37c   :  { %v2542_v29 = vpop.eup %2541  ;;  %2464 = vmatpush3.msra.mxu1 %v1795_v28 }
 0x37d   :  { %v2544_v42 = vpop.eup %2543  ;;  %v1640_v35 = vmul.f32 %v2542_v29, %v4149_v14  ;;  %2465 = vmatprep.subr.mxu1 %v1810_v32  ;;  %v1792_v14 = vld [vmem:[%s4297_s8 + $0x210] sm:$0xff] }
 0x37e   :  { %v1642_v44 = vmul.f32 %v2544_v42, %v4151_v15  ;;  %2466 = vmatpush3.msra.mxu1 %v1794_v19 }
 0x37f   :  { %v2546_v46 = vpop.eup %2545  ;;  %v1678_v47 = vmul.f32 %v1657_v40, %v1640_v35  ;;  %2467 = vmatprep.subr.mxu1 %v1809_v41 }
 0x380   :  { %v2548_v51 = vpop.eup %2547  ;;  %v1680_v15 = vmul.f32 %v1665_v30, %v1642_v44  ;;  %v1641_v52 = vmul.f32 %v2546_v46, %v4161_v31  ;;  %2468 = vmatpush3.msra.mxu1 %v1793_v43  ;;  %v1806_v31 = vld [vmem:[%s4297_s8 + $0x280] sm:$0xff] }
 0x381   :  { %v1643_v56 = vmul.f32 %v2548_v51, %v4163_v33  ;;  %2469 = vmatprep.subr.mxu1 %v1808_v48  ;;  %v1716_v33 = vadd.f32 %v1695_v50, %v1678_v47 }
 0x382   :  { %2470 = vmatpush3.msra.mxu1 %v1792_v14  ;;  %v1679_v59 = vmul.f32 %v1661_v45, %v1641_v52  ;;  %v1718_v1 = vadd.f32 %v1703_v55, %v1680_v15 }
 0x383   :  { %2471 = vmatprep.subr.mxu1 %v1807_v53  ;;  %v1681_v63 = vmul.f32 %v1669_v49, %v1643_v56  ;;  %v1722_v5 = vmax.f32 %v1716_v33, 0.0 }
 0x384   :  { %2472 = vmatpush3.msra.mxu1 %v1791_v62  ;;  %v1717_v0 = vadd.f32 %v1699_v54, %v1679_v59  ;;  %v1724_v6 = vmax.f32 %v1718_v1, 0.0 }
 0x385   :  { %2473 = vmatprep.subr.mxu1 %v1806_v31  ;;  %v1719_v2 = vadd.f32 %v1707_v57, %v1681_v63 }
 0x386   :  { %v1723_v4 = vmax.f32 %v1717_v0, 0.0  ;;  %2474 = vmatpush3.msra.mxu1 %v1790_v60 }
 0x387   :  { %v1725_v12 = vmax.f32 %v1719_v2, 0.0 }
 0x388   :  { %1963 = vmatprep.mubr.f32.mxu0 %v1723_v4 }
 0x389   :  { %2033 = vmatprep.mubr.f32.mxu1 %v1725_v12  ;;  %1964 = vmatmul.mubr.f32.vlgmr.msra.gmra.mxu0 %v1722_v5 }
 0x38a   :  { %2034 = vmatmul.mubr.f32.vlgmr.msra.gmra.mxu1 %v1724_v6 }
 0x427   :  { %v2405_v7 = vpop.f32.mrf.mxu1 }
 0x429   :  { %v2406_v8 = vpop.f32.mrf.mxu1 }
 0x42a   :  { %v2407_v11 = vadd.f32 %v2406_v8, %v2405_v7 }
 0x42c   :  { %v1896_v20 = vadd.f32 %v2407_v11, %v2346_v13 }
 0x449   :  { %v2440_v17 = vpop.f32.mrf.mxu0 }
 0x44a   :  { %v2475_v18 = vpop.f32.mrf.mxu1 }
 0x44b   :  { %v2441_v10 = vpop.f32.mrf.mxu0 }
 0x44c   :  { %v2442_v21 = vadd.f32 %v2441_v10, %v2440_v17  ;;  %v2476_v22 = vpop.f32.mrf.mxu1 }
 0x44d   :  { %v2477_v3 = vadd.f32 %v2476_v22, %v2475_v18 }
 0x44e   :  { %v1966_v9 = vadd.f32 %v2442_v21, %v1896_v20 }
 0x450   :  { %v2036_v25 = vadd.f32 %v2477_v3, %v1966_v9 }
 0x452   :  { %2040 = vst.msk [vmem:[#allocation2] sm:$0x3] %vm2039_vm3, %v2036_v25 }
 0x453   :  { %2560 = shalt.err (!%p2557_p4)
}
 0x454   :  { %2050 = dma.vmem_to_hbm [thread:$0]  %s2048_s16, 32, %s4299_s10, [#allocation3]  }
 0x455   :  { %2569 = dma.done.wait [#allocation3], 32  }
 0x456   :  { %2570 = vsyncadd [#allocation3], 4294967264 }
 0x457   :  { %2054 = vsyncpa [#allocation3], 1 }

</bundles_post_ra>
